<compile_context>
chip_gen: v7x
topology: tpu7x:2x2x1
jax: 0.10.0
libtpu: 0.0.40
codegen_flags: <defaults>
</compile_context>

<pallas_src>
import jax
import jax.numpy as jnp
from jax import lax
from jax.experimental import pallas as pl
from jax.experimental.pallas import tpu as pltpu


def _round_up(x, m):
    return (x + m - 1) // m * m


def _pad_to(a, shape):
    pads = [(0, s - d) for d, s in zip(a.shape, shape)]
    return jnp.pad(a.astype(jnp.float32), pads)


def _make_rnn_kernel(num_layers, seq_len, bb, h_pad, unroll_time, compute_dtype):
    """Builds the Pallas kernel body (all sizes static)."""

    def kernel(x_ref, *args):
        # args = [wih_T, whh_T, b] * num_layers, w_lin_T, b_lin, out_ref, proj_ref
        layer_refs = args[: 3 * num_layers]
        w_lin_ref, b_lin_ref, out_ref, proj_ref = args[3 * num_layers:]

        h_last = None
        for layer in range(num_layers):
            wih = layer_refs[3 * layer][...]        # (I_l_pad, Hp)  bf16
            whh = layer_refs[3 * layer + 1][...]    # (Hp, Hp)       bf16
            b = layer_refs[3 * layer + 2][...]      # (1, Hp)        f32 (b_ih+b_hh)
            last_layer = layer == num_layers - 1

            # --- 1) Whole-sequence input projection: one large bf16 MXU
            #        GEMM, f32 accumulation, bias fused, written to proj_ref.
            if layer == 0:
                inp = x_ref[...]                    # (T, bb, I_pad) f32
            else:
                inp = proj_ref[...]                 # (T, bb, Hp)    f32 (prev layer h)
            inp2d = inp.reshape(seq_len * bb, inp.shape[-1]).astype(compute_dtype)
            proj = jnp.dot(inp2d, wih, preferred_element_type=jnp.float32) + b
            proj_ref[...] = proj.reshape(seq_len, bb, h_pad)

            # --- 2) Recurrence: only h @ W_hh on the serial chain.
            # t = 0 peeled: h_{-1} == 0, so no recurrent matmul needed.
            h = jnp.tanh(proj_ref[0])
            if not last_layer:
                proj_ref[0] = h                      # in-place: next layer's input

            def step(t, h, whh=whh, last_layer=last_layer):
                rec = jnp.dot(h.astype(compute_dtype), whh,
                              preferred_element_type=jnp.float32)
                h_new = jnp.tanh(proj_ref[t] + rec)
                if not last_layer:
                    proj_ref[t] = h_new              # proj[t] already consumed
                return h_new

            if unroll_time:
                # Tiny shapes: full unroll with static time indices.
                for t in range(1, seq_len):
                    h = step(t, h)
            else:
                # Bounded register pressure for larger bb*Hp / long T.
                h = lax.fori_loop(1, seq_len, step, h, unroll=4)
            h_last = h

        # Final Linear + sigmoid on the last layer's h_T.
        logits = (jnp.dot(h_last.astype(compute_dtype), w_lin_ref[...],
                          preferred_element_type=jnp.float32) + b_lin_ref[...])
        out_ref[...] = jax.nn.sigmoid(logits)

    return kernel


def basic_rnn_forward(x, params):
    """x: (B, T, I) float32, batch_first like the PyTorch module."""
    B, T, I = x.shape
    num_layers = len(params["rnn"])
    H = params["rnn"][0]["w_hh"].shape[0]
    O = params["linear"]["w"].shape[0]

    compute_dtype = jnp.bfloat16   # MXU-native on v5e / v6e / v7x

    # Pad to TPU-friendly shapes: sublane multiple of 8, lane multiple of 128.
    Bp = _round_up(max(B, 8), 8)
    Ip = _round_up(max(I, 128), 128)
    Hp = _round_up(max(H, 128), 128)
    Op = _round_up(max(O, 128), 128)

    # Device-aware batch split: only v7x has 2 TensorCores per chip; on
    # v5e/v6e a 2-wide grid is a serial loop that doubles the recurrence.
    try:
        kind = jax.devices()[0].device_kind.lower()
    except Exception:  # pragma: no cover - e.g. interpret mode
        kind = ""
    is_v7 = ("v7" in kind) or ("tpu7" in kind) or ("tpu 7" in kind)
    nb = 2 if (is_v7 and Bp % 16 == 0 and (Bp // 2) >= 64) else 1
    bb = Bp // nb

    # Time-major, zero-padded input: (T, Bp, Ip), kept f32 (cast to bf16 at
    # the dot site inside the kernel).
    x_tm = jnp.transpose(x.astype(jnp.float32), (1, 0, 2))
    xp = jnp.zeros((T, Bp, Ip), jnp.float32).at[:, :B, :I].set(x_tm)

    kernel_inputs = [xp]
    for li, lp in enumerate(params["rnn"]):
        iin_p = Ip if li == 0 else Hp
        kernel_inputs.append(
            _pad_to(lp["w_ih"].T, (iin_p, Hp)).astype(compute_dtype))  # (I_l_pad, Hp)
        kernel_inputs.append(
            _pad_to(lp["w_hh"].T, (Hp, Hp)).astype(compute_dtype))     # (Hp, Hp)
        kernel_inputs.append(
            _pad_to(lp["b_ih"] + lp["b_hh"], (Hp,))[None, :])          # (1, Hp) f32
    kernel_inputs.append(
        _pad_to(params["linear"]["w"].T, (Hp, Op)).astype(compute_dtype))  # (Hp, Op)
    kernel_inputs.append(_pad_to(params["linear"]["b"], (Op,))[None, :])   # (1, Op) f32

    in_specs = [pl.BlockSpec((T, bb, Ip), lambda i: (0, i, 0))]
    for li in range(num_layers):
        iin_p = Ip if li == 0 else Hp
        in_specs += [
            pl.BlockSpec((iin_p, Hp), lambda i: (0, 0)),
            pl.BlockSpec((Hp, Hp), lambda i: (0, 0)),
            pl.BlockSpec((1, Hp), lambda i: (0, 0)),
        ]
    in_specs += [
        pl.BlockSpec((Hp, Op), lambda i: (0, 0)),
        pl.BlockSpec((1, Op), lambda i: (0, 0)),
    ]
    out_spec = pl.BlockSpec((bb, Op), lambda i: (i, 0))

    # Generation-aware VMEM budget (inputs double-buffered + one sequence
    # scratch + slack); 128 MiB physical on v5e/v6e vs 64 MiB on v7x.
    in_bytes = sum(int(a.size) * a.dtype.itemsize for a in kernel_inputs)
    scratch_bytes = T * bb * Hp * 4            # f32 proj/seq scratch
    out_bytes = Bp * Op * 4
    need = 2 * (in_bytes + out_bytes) + scratch_bytes + (4 << 20)
    cap = (56 << 20) if is_v7 else (100 << 20)
    vmem_limit = int(min(cap, max(32 << 20, need)))

    unroll_time = (T <= 32) and (bb * Hp <= 128 * 256)
    kernel = _make_rnn_kernel(num_layers, T, bb, Hp, unroll_time, compute_dtype)

    out_pad = pl.pallas_call(
        kernel,
        out_shape=jax.ShapeDtypeStruct((Bp, Op), jnp.float32),
        grid=(nb,),
        in_specs=in_specs,
        out_specs=out_spec,
        scratch_shapes=[
            pltpu.VMEM((T, bb, Hp), jnp.float32),   # proj_ref (proj, then h, in place)
        ],
        compiler_params=pltpu.CompilerParams(
            dimension_semantics=("parallel",),
            vmem_limit_bytes=vmem_limit),
    )(*kernel_inputs)

    return out_pad[:B, :O]


def init_params(key, input_size, hidden_size, output_size, num_layers):
    """Deterministic init matching the PyTorch parameter shapes."""
    keys = jax.random.split(key, 4 * num_layers + 2)
    k = 1.0 / jnp.sqrt(hidden_size).astype(jnp.float32)
    rnn_layers = []
    idx = 0
    for layer in range(num_layers):
        in_dim = input_size if layer == 0 else hidden_size
        w_ih = jax.random.uniform(keys[idx], (hidden_size, in_dim),
                                  minval=-k, maxval=k, dtype=jnp.float32); idx += 1
        w_hh = jax.random.uniform(keys[idx], (hidden_size, hidden_size),
                                  minval=-k, maxval=k, dtype=jnp.float32); idx += 1
        b_ih = jax.random.uniform(keys[idx], (hidden_size,),
                                  minval=-k, maxval=k, dtype=jnp.float32); idx += 1
        b_hh = jax.random.uniform(keys[idx], (hidden_size,),
                                  minval=-k, maxval=k, dtype=jnp.float32); idx += 1
        rnn_layers.append(dict(w_ih=w_ih, w_hh=w_hh, b_ih=b_ih, b_hh=b_hh))
    w_lin = jax.random.uniform(keys[idx], (output_size, hidden_size),
                               minval=-k, maxval=k, dtype=jnp.float32); idx += 1
    b_lin = jax.random.uniform(keys[idx], (output_size,),
                               minval=-k, maxval=k, dtype=jnp.float32)
    return {"rnn": rnn_layers, "linear": {"w": w_lin, "b": b_lin}}


def reference_forward(x, params):
    """Pure-JAX f32 reference mirroring torch.nn.RNN(tanh) + Linear + sigmoid."""
    B, T, _ = x.shape
    seq = x
    h = None
    for lp in params["rnn"]:
        H = lp["w_hh"].shape[0]
        h = jnp.zeros((B, H), jnp.float32)
        outs = []
        for t in range(T):
            h = jnp.tanh(seq[:, t, :] @ lp["w_ih"].T + lp["b_ih"]
                         + h @ lp["w_hh"].T + lp["b_hh"])
            outs.append(h)
        seq = jnp.stack(outs, axis=1)
    logits = h @ params["linear"]["w"].T + params["linear"]["b"]
    return jax.nn.sigmoid(logits)


if __name__ == "__main__":
    # Small shapes consistent with the module's forward.
    B, T = 2, 8
    input_size, hidden_size, output_size, num_layers = 16, 32, 8, 2

    key = jax.random.PRNGKey(0)
    kx, kp = jax.random.split(key)
    x = jax.random.normal(kx, (B, T, input_size), dtype=jnp.float32)
    params = init_params(kp, input_size, hidden_size, output_size, num_layers)

    out = basic_rnn_forward(x, params)
    out = jax.block_until_ready(out)

    ref = reference_forward(x, params)
    assert out.shape == (B, output_size)
    # bf16 MXU operands (f32 accumulation) => small drift vs. the f32 reference.
    assert jnp.allclose(out, ref, rtol=3e-2, atol=3e-2), (out, ref)

    print("KERNEL_OK")
</pallas_src>

<mosaic_0001>
module attributes {stable_mosaic.version = 11 : i64} {
  func.func @kernel(%arg0: i32, %arg1: memref<8x8x128xf32, #tpu.memory_space<vmem>>, %arg2: memref<128x128xbf16, #tpu.memory_space<vmem>>, %arg3: memref<128x128xbf16, #tpu.memory_space<vmem>>, %arg4: memref<1x128xf32, #tpu.memory_space<vmem>>, %arg5: memref<128x128xbf16, #tpu.memory_space<vmem>>, %arg6: memref<128x128xbf16, #tpu.memory_space<vmem>>, %arg7: memref<1x128xf32, #tpu.memory_space<vmem>>, %arg8: memref<128x128xbf16, #tpu.memory_space<vmem>>, %arg9: memref<1x128xf32, #tpu.memory_space<vmem>>, %arg10: memref<8x128xf32, #tpu.memory_space<vmem>>, %arg11: memref<8x8x128xf32, #tpu.memory_space<vmem>>) attributes {dimension_semantics = [#tpu.dimension_semantics<parallel>], iteration_bounds = array<i64: 1>, scalar_prefetch = 0 : i64, scratch_operands = 1 : i64, tpu.core_type = #tpu.core_type<tc>, window_params = [{transform_indices = @transform_0, window_bounds = array<i64: 8, 8, 128>}, {pipeline_mode = #tpu.pipeline_mode<synchronous>, transform_indices = @transform_1, window_bounds = array<i64: 128, 128>}, {pipeline_mode = #tpu.pipeline_mode<synchronous>, transform_indices = @transform_2, window_bounds = array<i64: 128, 128>}, {pipeline_mode = #tpu.pipeline_mode<synchronous>, transform_indices = @transform_3, window_bounds = array<i64: 1, 128>}, {pipeline_mode = #tpu.pipeline_mode<synchronous>, transform_indices = @transform_4, window_bounds = array<i64: 128, 128>}, {pipeline_mode = #tpu.pipeline_mode<synchronous>, transform_indices = @transform_5, window_bounds = array<i64: 128, 128>}, {pipeline_mode = #tpu.pipeline_mode<synchronous>, transform_indices = @transform_6, window_bounds = array<i64: 1, 128>}, {pipeline_mode = #tpu.pipeline_mode<synchronous>, transform_indices = @transform_7, window_bounds = array<i64: 128, 128>}, {pipeline_mode = #tpu.pipeline_mode<synchronous>, transform_indices = @transform_8, window_bounds = array<i64: 1, 128>}, {transform_indices = @transform_9, window_bounds = array<i64: 8, 128>}]} {
    %c0 = arith.constant 0 : index
    %c0_0 = arith.constant 0 : index
    %0 = vector.load %arg2[%c0, %c0_0] : memref<128x128xbf16, #tpu.memory_space<vmem>>, vector<128x128xbf16>
    %c0_1 = arith.constant 0 : index
    %c0_2 = arith.constant 0 : index
    %1 = vector.load %arg3[%c0_1, %c0_2] : memref<128x128xbf16, #tpu.memory_space<vmem>>, vector<128x128xbf16>
    %c0_3 = arith.constant 0 : index
    %c0_4 = arith.constant 0 : index
    %2 = vector.load %arg4[%c0_3, %c0_4] : memref<1x128xf32, #tpu.memory_space<vmem>>, vector<1x128xf32>
    %c0_5 = arith.constant 0 : index
    %c0_6 = arith.constant 0 : index
    %c0_7 = arith.constant 0 : index
    %3 = vector.load %arg1[%c0_5, %c0_6, %c0_7] : memref<8x8x128xf32, #tpu.memory_space<vmem>>, vector<8x8x128xf32>
    %4 = vector.shape_cast %3 : vector<8x8x128xf32> to vector<64x128xf32>
    %5 = arith.truncf %4 : vector<64x128xf32> to vector<64x128xbf16>
    %cst = arith.constant dense<0.000000e+00> : vector<64x128xf32>
    %6 = tpu.matmul %5, %0, %cst {dimension_numbers = #tpu.dot_dimension_numbers<[1], [0], [0], [1], [0, 0, 1, 1], [], []>} : vector<64x128xbf16>, vector<128x128xbf16>, vector<64x128xf32> -> vector<64x128xf32>
    %7 = vector.broadcast %2 : vector<1x128xf32> to vector<64x128xf32>
    %8 = arith.addf %6, %7 : vector<64x128xf32>
    %9 = vector.shape_cast %8 : vector<64x128xf32> to vector<8x8x128xf32>
    %c0_8 = arith.constant 0 : index
    %c0_9 = arith.constant 0 : index
    %c0_10 = arith.constant 0 : index
    %10 = vector.load %arg11[%c0_8, %c0_9, %c0_10] : memref<8x8x128xf32, #tpu.memory_space<vmem>>, vector<8x8x128xf32>
    tpu.vector_store %arg11[%c0_8, %c0_9, %c0_10], %9 {strides = array<i32>} : memref<8x8x128xf32, #tpu.memory_space<vmem>>, vector<8x8x128xf32>,
    %c0_11 = arith.constant 0 : index
    %c0_12 = arith.constant 0 : index
    %c0_13 = arith.constant 0 : index
    %11 = vector.load %arg11[%c0_11, %c0_12, %c0_13] : memref<8x8x128xf32, #tpu.memory_space<vmem>>, vector<1x8x128xf32>
    %12 = vector.shape_cast %11 : vector<1x8x128xf32> to vector<8x128xf32>
    %13 = math.tanh %12 : vector<8x128xf32>
    %c0_14 = arith.constant 0 : index
    %c0_15 = arith.constant 0 : index
    %c0_16 = arith.constant 0 : index
    %14 = vector.load %arg11[%c0_14, %c0_15, %c0_16] : memref<8x8x128xf32, #tpu.memory_space<vmem>>, vector<1x8x128xf32>
    %15 = vector.shape_cast %14 : vector<1x8x128xf32> to vector<8x128xf32>
    %16 = vector.shape_cast %13 : vector<8x128xf32> to vector<1x8x128xf32>
    tpu.vector_store %arg11[%c0_14, %c0_15, %c0_16], %16 {strides = array<i32>} : memref<8x8x128xf32, #tpu.memory_space<vmem>>, vector<1x8x128xf32>,
    %17 = arith.truncf %13 : vector<8x128xf32> to vector<8x128xbf16>
    %cst_17 = arith.constant dense<0.000000e+00> : vector<8x128xf32>
    %18 = tpu.matmul %17, %1, %cst_17 {dimension_numbers = #tpu.dot_dimension_numbers<[1], [0], [0], [1], [0, 0, 1, 1], [], []>} : vector<8x128xbf16>, vector<128x128xbf16>, vector<8x128xf32> -> vector<8x128xf32>
    %c1 = arith.constant 1 : index
    %c0_18 = arith.constant 0 : index
    %c0_19 = arith.constant 0 : index
    %19 = vector.load %arg11[%c1, %c0_18, %c0_19] : memref<8x8x128xf32, #tpu.memory_space<vmem>>, vector<1x8x128xf32>
    %20 = vector.shape_cast %19 : vector<1x8x128xf32> to vector<8x128xf32>
    %21 = arith.addf %20, %18 : vector<8x128xf32>
    %22 = math.tanh %21 : vector<8x128xf32>
    %c1_20 = arith.constant 1 : index
    %c0_21 = arith.constant 0 : index
    %c0_22 = arith.constant 0 : index
    %23 = vector.load %arg11[%c1_20, %c0_21, %c0_22] : memref<8x8x128xf32, #tpu.memory_space<vmem>>, vector<1x8x128xf32>
    %24 = vector.shape_cast %23 : vector<1x8x128xf32> to vector<8x128xf32>
    %25 = vector.shape_cast %22 : vector<8x128xf32> to vector<1x8x128xf32>
    tpu.vector_store %arg11[%c1_20, %c0_21, %c0_22], %25 {strides = array<i32>} : memref<8x8x128xf32, #tpu.memory_space<vmem>>, vector<1x8x128xf32>,
    %26 = arith.truncf %22 : vector<8x128xf32> to vector<8x128xbf16>
    %cst_23 = arith.constant dense<0.000000e+00> : vector<8x128xf32>
    %27 = tpu.matmul %26, %1, %cst_23 {dimension_numbers = #tpu.dot_dimension_numbers<[1], [0], [0], [1], [0, 0, 1, 1], [], []>} : vector<8x128xbf16>, vector<128x128xbf16>, vector<8x128xf32> -> vector<8x128xf32>
    %c2 = arith.constant 2 : index
    %c0_24 = arith.constant 0 : index
    %c0_25 = arith.constant 0 : index
    %28 = vector.load %arg11[%c2, %c0_24, %c0_25] : memref<8x8x128xf32, #tpu.memory_space<vmem>>, vector<1x8x128xf32>
    %29 = vector.shape_cast %28 : vector<1x8x128xf32> to vector<8x128xf32>
    %30 = arith.addf %29, %27 : vector<8x128xf32>
    %31 = math.tanh %30 : vector<8x128xf32>
    %c2_26 = arith.constant 2 : index
    %c0_27 = arith.constant 0 : index
    %c0_28 = arith.constant 0 : index
    %32 = vector.load %arg11[%c2_26, %c0_27, %c0_28] : memref<8x8x128xf32, #tpu.memory_space<vmem>>, vector<1x8x128xf32>
    %33 = vector.shape_cast %32 : vector<1x8x128xf32> to vector<8x128xf32>
    %34 = vector.shape_cast %31 : vector<8x128xf32> to vector<1x8x128xf32>
    tpu.vector_store %arg11[%c2_26, %c0_27, %c0_28], %34 {strides = array<i32>} : memref<8x8x128xf32, #tpu.memory_space<vmem>>, vector<1x8x128xf32>,
    %35 = arith.truncf %31 : vector<8x128xf32> to vector<8x128xbf16>
    %cst_29 = arith.constant dense<0.000000e+00> : vector<8x128xf32>
    %36 = tpu.matmul %35, %1, %cst_29 {dimension_numbers = #tpu.dot_dimension_numbers<[1], [0], [0], [1], [0, 0, 1, 1], [], []>} : vector<8x128xbf16>, vector<128x128xbf16>, vector<8x128xf32> -> vector<8x128xf32>
    %c3 = arith.constant 3 : index
    %c0_30 = arith.constant 0 : index
    %c0_31 = arith.constant 0 : index
    %37 = vector.load %arg11[%c3, %c0_30, %c0_31] : memref<8x8x128xf32, #tpu.memory_space<vmem>>, vector<1x8x128xf32>
    %38 = vector.shape_cast %37 : vector<1x8x128xf32> to vector<8x128xf32>
    %39 = arith.addf %38, %36 : vector<8x128xf32>
    %40 = math.tanh %39 : vector<8x128xf32>
    %c3_32 = arith.constant 3 : index
    %c0_33 = arith.constant 0 : index
    %c0_34 = arith.constant 0 : index
    %41 = vector.load %arg11[%c3_32, %c0_33, %c0_34] : memref<8x8x128xf32, #tpu.memory_space<vmem>>, vector<1x8x128xf32>
    %42 = vector.shape_cast %41 : vector<1x8x128xf32> to vector<8x128xf32>
    %43 = vector.shape_cast %40 : vector<8x128xf32> to vector<1x8x128xf32>
    tpu.vector_store %arg11[%c3_32, %c0_33, %c0_34], %43 {strides = array<i32>} : memref<8x8x128xf32, #tpu.memory_space<vmem>>, vector<1x8x128xf32>,
    %44 = arith.truncf %40 : vector<8x128xf32> to vector<8x128xbf16>
    %cst_35 = arith.constant dense<0.000000e+00> : vector<8x128xf32>
    %45 = tpu.matmul %44, %1, %cst_35 {dimension_numbers = #tpu.dot_dimension_numbers<[1], [0], [0], [1], [0, 0, 1, 1], [], []>} : vector<8x128xbf16>, vector<128x128xbf16>, vector<8x128xf32> -> vector<8x128xf32>
    %c4 = arith.constant 4 : index
    %c0_36 = arith.constant 0 : index
    %c0_37 = arith.constant 0 : index
    %46 = vector.load %arg11[%c4, %c0_36, %c0_37] : memref<8x8x128xf32, #tpu.memory_space<vmem>>, vector<1x8x128xf32>
    %47 = vector.shape_cast %46 : vector<1x8x128xf32> to vector<8x128xf32>
    %48 = arith.addf %47, %45 : vector<8x128xf32>
    %49 = math.tanh %48 : vector<8x128xf32>
    %c4_38 = arith.constant 4 : index
    %c0_39 = arith.constant 0 : index
    %c0_40 = arith.constant 0 : index
    %50 = vector.load %arg11[%c4_38, %c0_39, %c0_40] : memref<8x8x128xf32, #tpu.memory_space<vmem>>, vector<1x8x128xf32>
    %51 = vector.shape_cast %50 : vector<1x8x128xf32> to vector<8x128xf32>
    %52 = vector.shape_cast %49 : vector<8x128xf32> to vector<1x8x128xf32>
    tpu.vector_store %arg11[%c4_38, %c0_39, %c0_40], %52 {strides = array<i32>} : memref<8x8x128xf32, #tpu.memory_space<vmem>>, vector<1x8x128xf32>,
    %53 = arith.truncf %49 : vector<8x128xf32> to vector<8x128xbf16>
    %cst_41 = arith.constant dense<0.000000e+00> : vector<8x128xf32>
    %54 = tpu.matmul %53, %1, %cst_41 {dimension_numbers = #tpu.dot_dimension_numbers<[1], [0], [0], [1], [0, 0, 1, 1], [], []>} : vector<8x128xbf16>, vector<128x128xbf16>, vector<8x128xf32> -> vector<8x128xf32>
    %c5 = arith.constant 5 : index
    %c0_42 = arith.constant 0 : index
    %c0_43 = arith.constant 0 : index
    %55 = vector.load %arg11[%c5, %c0_42, %c0_43] : memref<8x8x128xf32, #tpu.memory_space<vmem>>, vector<1x8x128xf32>
    %56 = vector.shape_cast %55 : vector<1x8x128xf32> to vector<8x128xf32>
    %57 = arith.addf %56, %54 : vector<8x128xf32>
    %58 = math.tanh %57 : vector<8x128xf32>
    %c5_44 = arith.constant 5 : index
    %c0_45 = arith.constant 0 : index
    %c0_46 = arith.constant 0 : index
    %59 = vector.load %arg11[%c5_44, %c0_45, %c0_46] : memref<8x8x128xf32, #tpu.memory_space<vmem>>, vector<1x8x128xf32>
    %60 = vector.shape_cast %59 : vector<1x8x128xf32> to vector<8x128xf32>
    %61 = vector.shape_cast %58 : vector<8x128xf32> to vector<1x8x128xf32>
    tpu.vector_store %arg11[%c5_44, %c0_45, %c0_46], %61 {strides = array<i32>} : memref<8x8x128xf32, #tpu.memory_space<vmem>>, vector<1x8x128xf32>,
    %62 = arith.truncf %58 : vector<8x128xf32> to vector<8x128xbf16>
    %cst_47 = arith.constant dense<0.000000e+00> : vector<8x128xf32>
    %63 = tpu.matmul %62, %1, %cst_47 {dimension_numbers = #tpu.dot_dimension_numbers<[1], [0], [0], [1], [0, 0, 1, 1], [], []>} : vector<8x128xbf16>, vector<128x128xbf16>, vector<8x128xf32> -> vector<8x128xf32>
    %c6 = arith.constant 6 : index
    %c0_48 = arith.constant 0 : index
    %c0_49 = arith.constant 0 : index
    %64 = vector.load %arg11[%c6, %c0_48, %c0_49] : memref<8x8x128xf32, #tpu.memory_space<vmem>>, vector<1x8x128xf32>
    %65 = vector.shape_cast %64 : vector<1x8x128xf32> to vector<8x128xf32>
    %66 = arith.addf %65, %63 : vector<8x128xf32>
    %67 = math.tanh %66 : vector<8x128xf32>
    %c6_50 = arith.constant 6 : index
    %c0_51 = arith.constant 0 : index
    %c0_52 = arith.constant 0 : index
    %68 = vector.load %arg11[%c6_50, %c0_51, %c0_52] : memref<8x8x128xf32, #tpu.memory_space<vmem>>, vector<1x8x128xf32>
    %69 = vector.shape_cast %68 : vector<1x8x128xf32> to vector<8x128xf32>
    %70 = vector.shape_cast %67 : vector<8x128xf32> to vector<1x8x128xf32>
    tpu.vector_store %arg11[%c6_50, %c0_51, %c0_52], %70 {strides = array<i32>} : memref<8x8x128xf32, #tpu.memory_space<vmem>>, vector<1x8x128xf32>,
    %71 = arith.truncf %67 : vector<8x128xf32> to vector<8x128xbf16>
    %cst_53 = arith.constant dense<0.000000e+00> : vector<8x128xf32>
    %72 = tpu.matmul %71, %1, %cst_53 {dimension_numbers = #tpu.dot_dimension_numbers<[1], [0], [0], [1], [0, 0, 1, 1], [], []>} : vector<8x128xbf16>, vector<128x128xbf16>, vector<8x128xf32> -> vector<8x128xf32>
    %c7 = arith.constant 7 : index
    %c0_54 = arith.constant 0 : index
    %c0_55 = arith.constant 0 : index
    %73 = vector.load %arg11[%c7, %c0_54, %c0_55] : memref<8x8x128xf32, #tpu.memory_space<vmem>>, vector<1x8x128xf32>
    %74 = vector.shape_cast %73 : vector<1x8x128xf32> to vector<8x128xf32>
    %75 = arith.addf %74, %72 : vector<8x128xf32>
    %76 = math.tanh %75 : vector<8x128xf32>
    %c7_56 = arith.constant 7 : index
    %c0_57 = arith.constant 0 : index
    %c0_58 = arith.constant 0 : index
    %77 = vector.load %arg11[%c7_56, %c0_57, %c0_58] : memref<8x8x128xf32, #tpu.memory_space<vmem>>, vector<1x8x128xf32>
    %78 = vector.shape_cast %77 : vector<1x8x128xf32> to vector<8x128xf32>
    %79 = vector.shape_cast %76 : vector<8x128xf32> to vector<1x8x128xf32>
    tpu.vector_store %arg11[%c7_56, %c0_57, %c0_58], %79 {strides = array<i32>} : memref<8x8x128xf32, #tpu.memory_space<vmem>>, vector<1x8x128xf32>,
    %c0_59 = arith.constant 0 : index
    %c0_60 = arith.constant 0 : index
    %80 = vector.load %arg5[%c0_59, %c0_60] : memref<128x128xbf16, #tpu.memory_space<vmem>>, vector<128x128xbf16>
    %c0_61 = arith.constant 0 : index
    %c0_62 = arith.constant 0 : index
    %81 = vector.load %arg6[%c0_61, %c0_62] : memref<128x128xbf16, #tpu.memory_space<vmem>>, vector<128x128xbf16>
    %c0_63 = arith.constant 0 : index
    %c0_64 = arith.constant 0 : index
    %82 = vector.load %arg7[%c0_63, %c0_64] : memref<1x128xf32, #tpu.memory_space<vmem>>, vector<1x128xf32>
    %c0_65 = arith.constant 0 : index
    %c0_66 = arith.constant 0 : index
    %c0_67 = arith.constant 0 : index
    %83 = vector.load %arg11[%c0_65, %c0_66, %c0_67] : memref<8x8x128xf32, #tpu.memory_space<vmem>>, vector<8x8x128xf32>
    %84 = vector.shape_cast %83 : vector<8x8x128xf32> to vector<64x128xf32>
    %85 = arith.truncf %84 : vector<64x128xf32> to vector<64x128xbf16>
    %cst_68 = arith.constant dense<0.000000e+00> : vector<64x128xf32>
    %86 = tpu.matmul %85, %80, %cst_68 {dimension_numbers = #tpu.dot_dimension_numbers<[1], [0], [0], [1], [0, 0, 1, 1], [], []>} : vector<64x128xbf16>, vector<128x128xbf16>, vector<64x128xf32> -> vector<64x128xf32>
    %87 = vector.broadcast %82 : vector<1x128xf32> to vector<64x128xf32>
    %88 = arith.addf %86, %87 : vector<64x128xf32>
    %89 = vector.shape_cast %88 : vector<64x128xf32> to vector<8x8x128xf32>
    %c0_69 = arith.constant 0 : index
    %c0_70 = arith.constant 0 : index
    %c0_71 = arith.constant 0 : index
    %90 = vector.load %arg11[%c0_69, %c0_70, %c0_71] : memref<8x8x128xf32, #tpu.memory_space<vmem>>, vector<8x8x128xf32>
    tpu.vector_store %arg11[%c0_69, %c0_70, %c0_71], %89 {strides = array<i32>} : memref<8x8x128xf32, #tpu.memory_space<vmem>>, vector<8x8x128xf32>,
    %c0_72 = arith.constant 0 : index
    %c0_73 = arith.constant 0 : index
    %c0_74 = arith.constant 0 : index
    %91 = vector.load %arg11[%c0_72, %c0_73, %c0_74] : memref<8x8x128xf32, #tpu.memory_space<vmem>>, vector<1x8x128xf32>
    %92 = vector.shape_cast %91 : vector<1x8x128xf32> to vector<8x128xf32>
    %93 = math.tanh %92 : vector<8x128xf32>
    %94 = arith.truncf %93 : vector<8x128xf32> to vector<8x128xbf16>
    %cst_75 = arith.constant dense<0.000000e+00> : vector<8x128xf32>
    %95 = tpu.matmul %94, %81, %cst_75 {dimension_numbers = #tpu.dot_dimension_numbers<[1], [0], [0], [1], [0, 0, 1, 1], [], []>} : vector<8x128xbf16>, vector<128x128xbf16>, vector<8x128xf32> -> vector<8x128xf32>
    %c1_76 = arith.constant 1 : index
    %c0_77 = arith.constant 0 : index
    %c0_78 = arith.constant 0 : index
    %96 = vector.load %arg11[%c1_76, %c0_77, %c0_78] : memref<8x8x128xf32, #tpu.memory_space<vmem>>, vector<1x8x128xf32>
    %97 = vector.shape_cast %96 : vector<1x8x128xf32> to vector<8x128xf32>
    %98 = arith.addf %97, %95 : vector<8x128xf32>
    %99 = math.tanh %98 : vector<8x128xf32>
    %100 = arith.truncf %99 : vector<8x128xf32> to vector<8x128xbf16>
    %cst_79 = arith.constant dense<0.000000e+00> : vector<8x128xf32>
    %101 = tpu.matmul %100, %81, %cst_79 {dimension_numbers = #tpu.dot_dimension_numbers<[1], [0], [0], [1], [0, 0, 1, 1], [], []>} : vector<8x128xbf16>, vector<128x128xbf16>, vector<8x128xf32> -> vector<8x128xf32>
    %c2_80 = arith.constant 2 : index
    %c0_81 = arith.constant 0 : index
    %c0_82 = arith.constant 0 : index
    %102 = vector.load %arg11[%c2_80, %c0_81, %c0_82] : memref<8x8x128xf32, #tpu.memory_space<vmem>>, vector<1x8x128xf32>
    %103 = vector.shape_cast %102 : vector<1x8x128xf32> to vector<8x128xf32>
    %104 = arith.addf %103, %101 : vector<8x128xf32>
    %105 = math.tanh %104 : vector<8x128xf32>
    %106 = arith.truncf %105 : vector<8x128xf32> to vector<8x128xbf16>
    %cst_83 = arith.constant dense<0.000000e+00> : vector<8x128xf32>
    %107 = tpu.matmul %106, %81, %cst_83 {dimension_numbers = #tpu.dot_dimension_numbers<[1], [0], [0], [1], [0, 0, 1, 1], [], []>} : vector<8x128xbf16>, vector<128x128xbf16>, vector<8x128xf32> -> vector<8x128xf32>
    %c3_84 = arith.constant 3 : index
    %c0_85 = arith.constant 0 : index
    %c0_86 = arith.constant 0 : index
    %108 = vector.load %arg11[%c3_84, %c0_85, %c0_86] : memref<8x8x128xf32, #tpu.memory_space<vmem>>, vector<1x8x128xf32>
    %109 = vector.shape_cast %108 : vector<1x8x128xf32> to vector<8x128xf32>
    %110 = arith.addf %109, %107 : vector<8x128xf32>
    %111 = math.tanh %110 : vector<8x128xf32>
    %112 = arith.truncf %111 : vector<8x128xf32> to vector<8x128xbf16>
    %cst_87 = arith.constant dense<0.000000e+00> : vector<8x128xf32>
    %113 = tpu.matmul %112, %81, %cst_87 {dimension_numbers = #tpu.dot_dimension_numbers<[1], [0], [0], [1], [0, 0, 1, 1], [], []>} : vector<8x128xbf16>, vector<128x128xbf16>, vector<8x128xf32> -> vector<8x128xf32>
    %c4_88 = arith.constant 4 : index
    %c0_89 = arith.constant 0 : index
    %c0_90 = arith.constant 0 : index
    %114 = vector.load %arg11[%c4_88, %c0_89, %c0_90] : memref<8x8x128xf32, #tpu.memory_space<vmem>>, vector<1x8x128xf32>
    %115 = vector.shape_cast %114 : vector<1x8x128xf32> to vector<8x128xf32>
    %116 = arith.addf %115, %113 : vector<8x128xf32>
    %117 = math.tanh %116 : vector<8x128xf32>
    %118 = arith.truncf %117 : vector<8x128xf32> to vector<8x128xbf16>
    %cst_91 = arith.constant dense<0.000000e+00> : vector<8x128xf32>
    %119 = tpu.matmul %118, %81, %cst_91 {dimension_numbers = #tpu.dot_dimension_numbers<[1], [0], [0], [1], [0, 0, 1, 1], [], []>} : vector<8x128xbf16>, vector<128x128xbf16>, vector<8x128xf32> -> vector<8x128xf32>
    %c5_92 = arith.constant 5 : index
    %c0_93 = arith.constant 0 : index
    %c0_94 = arith.constant 0 : index
    %120 = vector.load %arg11[%c5_92, %c0_93, %c0_94] : memref<8x8x128xf32, #tpu.memory_space<vmem>>, vector<1x8x128xf32>
    %121 = vector.shape_cast %120 : vector<1x8x128xf32> to vector<8x128xf32>
    %122 = arith.addf %121, %119 : vector<8x128xf32>
    %123 = math.tanh %122 : vector<8x128xf32>
    %124 = arith.truncf %123 : vector<8x128xf32> to vector<8x128xbf16>
    %cst_95 = arith.constant dense<0.000000e+00> : vector<8x128xf32>
    %125 = tpu.matmul %124, %81, %cst_95 {dimension_numbers = #tpu.dot_dimension_numbers<[1], [0], [0], [1], [0, 0, 1, 1], [], []>} : vector<8x128xbf16>, vector<128x128xbf16>, vector<8x128xf32> -> vector<8x128xf32>
    %c6_96 = arith.constant 6 : index
    %c0_97 = arith.constant 0 : index
    %c0_98 = arith.constant 0 : index
    %126 = vector.load %arg11[%c6_96, %c0_97, %c0_98] : memref<8x8x128xf32, #tpu.memory_space<vmem>>, vector<1x8x128xf32>
    %127 = vector.shape_cast %126 : vector<1x8x128xf32> to vector<8x128xf32>
    %128 = arith.addf %127, %125 : vector<8x128xf32>
    %129 = math.tanh %128 : vector<8x128xf32>
    %130 = arith.truncf %129 : vector<8x128xf32> to vector<8x128xbf16>
    %cst_99 = arith.constant dense<0.000000e+00> : vector<8x128xf32>
    %131 = tpu.matmul %130, %81, %cst_99 {dimension_numbers = #tpu.dot_dimension_numbers<[1], [0], [0], [1], [0, 0, 1, 1], [], []>} : vector<8x128xbf16>, vector<128x128xbf16>, vector<8x128xf32> -> vector<8x128xf32>
    %c7_100 = arith.constant 7 : index
    %c0_101 = arith.constant 0 : index
    %c0_102 = arith.constant 0 : index
    %132 = vector.load %arg11[%c7_100, %c0_101, %c0_102] : memref<8x8x128xf32, #tpu.memory_space<vmem>>, vector<1x8x128xf32>
    %133 = vector.shape_cast %132 : vector<1x8x128xf32> to vector<8x128xf32>
    %134 = arith.addf %133, %131 : vector<8x128xf32>
    %135 = math.tanh %134 : vector<8x128xf32>
    %136 = arith.truncf %135 : vector<8x128xf32> to vector<8x128xbf16>
    %c0_103 = arith.constant 0 : index
    %c0_104 = arith.constant 0 : index
    %137 = vector.load %arg8[%c0_103, %c0_104] : memref<128x128xbf16, #tpu.memory_space<vmem>>, vector<128x128xbf16>
    %cst_105 = arith.constant dense<0.000000e+00> : vector<8x128xf32>
    %138 = tpu.matmul %136, %137, %cst_105 {dimension_numbers = #tpu.dot_dimension_numbers<[1], [0], [0], [1], [0, 0, 1, 1], [], []>} : vector<8x128xbf16>, vector<128x128xbf16>, vector<8x128xf32> -> vector<8x128xf32>
    %c0_106 = arith.constant 0 : index
    %c0_107 = arith.constant 0 : index
    %139 = vector.load %arg9[%c0_106, %c0_107] : memref<1x128xf32, #tpu.memory_space<vmem>>, vector<1x128xf32>
    %140 = vector.broadcast %139 : vector<1x128xf32> to vector<8x128xf32>
    %141 = arith.addf %138, %140 : vector<8x128xf32>
    %142 = arith.negf %141 : vector<8x128xf32>
    %143 = math.exp %142 : vector<8x128xf32>
    %cst_108 = arith.constant 1.000000e+00 : f32
    %144 = vector.broadcast %cst_108 : f32 to vector<8x128xf32>
    %145 = arith.addf %144, %143 : vector<8x128xf32>
    %146 = arith.divf %144, %145 : vector<8x128xf32>
    %c0_109 = arith.constant 0 : index
    %c0_110 = arith.constant 0 : index
    %147 = vector.load %arg10[%c0_109, %c0_110] : memref<8x128xf32, #tpu.memory_space<vmem>>, vector<8x128xf32>
    tpu.vector_store %arg10[%c0_109, %c0_110], %146 {strides = array<i32>} : memref<8x128xf32, #tpu.memory_space<vmem>>, vector<8x128xf32>,
    return
  }
  func.func @transform_0(%arg0: i32) -> (i32, i32, i32) {
    %c0_i32 = arith.constant 0 : i32
    %c0_i32_0 = arith.constant 0 : i32
    %c0_i32_1 = arith.constant 0 : i32
    return %c0_i32, %arg0, %c0_i32_0 : i32, i32, i32
  }
  func.func @transform_1(%arg0: i32) -> (i32, i32) {
    %c0_i32 = arith.constant 0 : i32
    %c0_i32_0 = arith.constant 0 : i32
    %c0_i32_1 = arith.constant 0 : i32
    return %c0_i32, %c0_i32_0 : i32, i32
  }
  func.func @transform_2(%arg0: i32) -> (i32, i32) {
    %c0_i32 = arith.constant 0 : i32
    %c0_i32_0 = arith.constant 0 : i32
    %c0_i32_1 = arith.constant 0 : i32
    return %c0_i32, %c0_i32_0 : i32, i32
  }
  func.func @transform_3(%arg0: i32) -> (i32, i32) {
    %c0_i32 = arith.constant 0 : i32
    %c0_i32_0 = arith.constant 0 : i32
    %c0_i32_1 = arith.constant 0 : i32
    return %c0_i32, %c0_i32_0 : i32, i32
  }
  func.func @transform_4(%arg0: i32) -> (i32, i32) {
    %c0_i32 = arith.constant 0 : i32
    %c0_i32_0 = arith.constant 0 : i32
    %c0_i32_1 = arith.constant 0 : i32
    return %c0_i32, %c0_i32_0 : i32, i32
  }
  func.func @transform_5(%arg0: i32) -> (i32, i32) {
    %c0_i32 = arith.constant 0 : i32
    %c0_i32_0 = arith.constant 0 : i32
    %c0_i32_1 = arith.constant 0 : i32
    return %c0_i32, %c0_i32_0 : i32, i32
  }
  func.func @transform_6(%arg0: i32) -> (i32, i32) {
    %c0_i32 = arith.constant 0 : i32
    %c0_i32_0 = arith.constant 0 : i32
    %c0_i32_1 = arith.constant 0 : i32
    return %c0_i32, %c0_i32_0 : i32, i32
  }
  func.func @transform_7(%arg0: i32) -> (i32, i32) {
    %c0_i32 = arith.constant 0 : i32
    %c0_i32_0 = arith.constant 0 : i32
    %c0_i32_1 = arith.constant 0 : i32
    return %c0_i32, %c0_i32_0 : i32, i32
  }
  func.func @transform_8(%arg0: i32) -> (i32, i32) {
    %c0_i32 = arith.constant 0 : i32
    %c0_i32_0 = arith.constant 0 : i32
    %c0_i32_1 = arith.constant 0 : i32
    return %c0_i32, %c0_i32_0 : i32, i32
  }
  func.func @transform_9(%arg0: i32) -> (i32, i32) {
    %c0_i32 = arith.constant 0 : i32
    %c0_i32_0 = arith.constant 0 : i32
    return %arg0, %c0_i32 : i32, i32
  }
}

</mosaic_0001>

<bundles_post_ra>
// kernel: tpu_custom_call.1
= control target key start
LH: loop header
LB: loop body
LE: loop exit
PB: predicated region body
PF: predicated region fallthrough
CT: control target
= control target key end

     0   :  { %14 = vsyncpa [#allocation4], 0  ;;  %s2667_s0 = inlined_call_operand.hbm [shape: f32[8,8,128], index: 0, kind: input, shape index: {}]   ;;  %s2668_s1 = inlined_call_operand.hbm [shape: bf16[128,128], index: 1, kind: input, shape index: {}]   ;;  %s2669_s2 = inlined_call_operand.hbm [shape: bf16[128,128], index: 2, kind: input, shape index: {}]   ;;  %s2670_s3 = inlined_call_operand.vmem [shape: f32[1,128], index: 3, kind: input, shape index: {}]   ;;  %s2671_s4 = inlined_call_operand.hbm [shape: bf16[128,128], index: 4, kind: input, shape index: {}]   ;;  %s2672_s5 = inlined_call_operand.hbm [shape: bf16[128,128], index: 5, kind: input, shape index: {}]   ;;  %s2673_s6 = inlined_call_operand.vmem [shape: f32[1,128], index: 6, kind: input, shape index: {}]   ;;  %s2674_s7 = inlined_call_operand.hbm [shape: bf16[128,128], index: 7, kind: input, shape index: {}]   ;;  %s2675_s8 = inlined_call_operand.vmem [shape: f32[1,128], index: 8, kind: input, shape index: {}]   ;;  %s2676_s9 = inlined_call_operand.hbm [shape: f32[8,128], index: 9, kind: output, shape index: {}]  }
   0x1   :  { %15 = vsyncpa [#allocation7], 0 }
   0x2   :  { %16 = vsyncpa [#allocation10], 0 }
   0x3   :  { %17 = vsyncpa [#allocation13], 0 }
   0x4   :  { %18 = vsyncpa [#allocation5], 0  ;;  %s2132_s30 = smov [#allocation6]   ;;  %s1968_s13 = scalar_lea.hbm %s2668_s1, 1024 }
   0x5   :  { %s36_s10 = sshll.u32 %s2132_s30, 4  ;;  %p1969_p0 = scmp.ne.s32.totalorder %s2668_s1, %s1968_s13  ;;  %s37_s10 = int_to_ptr.vmem [resolvable:$true] %s36_s10 }
   0x6   :  { %p1972_p1 = scmp.lt.u32.totalorder %s1968_s13, %s2668_s1 }
   0x8   :  { %p1974_p2 = pnand %p1972_p1, %p1969_p0 }
   0xa   :  { %1977 = shalt.err (!%p1974_p2)
}
   0xb   :  { %s1978_s18 = scalar_lea.vmem %s37_s10, 1024  ;;  %p1983_p4 = scmp.lt.s32.totalorder %s37_s10, %s37_s10 }
   0xc   :  { %p1979_p3 = scmp.ne.s32.totalorder %s37_s10, %s1978_s18  ;;  %p1984_p5 = scmp.lt.s32.totalorder %s1978_s18, %s1978_s18 }
   0xe   :  { %p1985_p6 = por %p1984_p5, %p1983_p4 }
  0x10   :  { %p1986_p7 = pnand %p1985_p6, %p1979_p3 }
  0x12   :  { %1989 = shalt.err (!%p1986_p7)
}
  0x13   :  { %s2133_s19 = smov 64   ;;  %s2134_s20 = smov 4  }
  0x14   :  { %42 = dma.hbm_to_vmem [thread:$0]  %s2668_s1, 1024, %s37_s10, [#allocation7], %s2133_s19, %s2133_s19, %s2134_s20  }
  0x15   :  { %s2135_s23 = smov [#allocation9]   ;;  %s2136_s25 = smov [#allocation3]  }
  0x16   :  { %s62_s24 = sshll.u32 %s2135_s23, 4  ;;  %s24_s26 = sshll.u32 %s2136_s25, 4  ;;  %s63_s24 = int_to_ptr.vmem [resolvable:$true] %s62_s24  ;;  %s25_s26 = int_to_ptr.vmem [resolvable:$true] %s24_s26 }
  0x17   :  { %s1990_s29 = scalar_lea.hbm %s2671_s4, 1024 }
  0x18   :  { %p1991_p8 = scmp.ne.s32.totalorder %s2671_s4, %s1990_s29  ;;  %p1994_p9 = scmp.lt.u32.totalorder %s1990_s29, %s2671_s4 }
  0x1a   :  { %p1996_p10 = pnand %p1994_p9, %p1991_p8 }
  0x1c   :  { %1999 = shalt.err (!%p1996_p10)
}
  0x1d   :  { %s2000_s1 = scalar_lea.vmem %s63_s24, 1024  ;;  %p2005_p12 = scmp.lt.s32.totalorder %s63_s24, %s63_s24 }
  0x1e   :  { %p2001_p11 = scmp.ne.s32.totalorder %s63_s24, %s2000_s1  ;;  %p2006_p13 = scmp.lt.s32.totalorder %s2000_s1, %s2000_s1 }
  0x20   :  { %p2007_p0 = por %p2006_p13, %p2005_p12 }
  0x22   :  { %p2008_p1 = pnand %p2007_p0, %p2001_p11 }
  0x24   :  { %2011 = shalt.err (!%p2008_p1)
}
  0x25   :  { %68 = dma.hbm_to_vmem [thread:$0]  %s2671_s4, 1024, %s63_s24, [#allocation10], %s2133_s19, %s2133_s19, %s2134_s20  }
  0x26   :  { %s2012_s17 = scalar_lea.hbm %s2667_s0, 1024 }
  0x27   :  { %p2013_p2 = scmp.ne.s32.totalorder %s2667_s0, %s2012_s17  ;;  %p2016_p3 = scmp.lt.u32.totalorder %s2012_s17, %s2667_s0 }
  0x29   :  { %p2018_p4 = pnand %p2016_p3, %p2013_p2 }
  0x2b   :  { %2021 = shalt.err (!%p2018_p4)
}
  0x2c   :  { %s2022_s25 = scalar_lea.vmem %s25_s26, 1024  ;;  %p2027_p6 = scmp.lt.s32.totalorder %s25_s26, %s25_s26 }
  0x2d   :  { %p2023_p5 = scmp.ne.s32.totalorder %s25_s26, %s2022_s25  ;;  %p2028_p7 = scmp.lt.s32.totalorder %s2022_s25, %s2022_s25 }
  0x2f   :  { %p2029_p8 = por %p2028_p7, %p2027_p6 }
  0x31   :  { %p2030_p9 = pnand %p2029_p8, %p2023_p5 }
  0x33   :  { %2033 = shalt.err (!%p2030_p9)
}
  0x34   :  { %s2137_s4 = smov 128   ;;  %s2138_s24 = smov 8  }
  0x35   :  { %30 = dma.hbm_to_vmem [thread:$0]  %s2667_s0, 1024, %s25_s26, [#allocation4], %s2137_s4, %s2137_s4, %s2138_s24  }
  0x36   :  { %s2139_s29 = smov [#allocation8]   ;;  %s2140_s11 = smov [#allocation11]  }
  0x37   :  { %s48_s30 = sshll.u32 %s2139_s29, 4  ;;  %s74_s12 = sshll.u32 %s2140_s11, 4  ;;  %s49_s30 = int_to_ptr.vmem [resolvable:$true] %s48_s30  ;;  %s75_s12 = int_to_ptr.vmem [resolvable:$true] %s74_s12 }
  0x38   :  { %s2034_s10 = scalar_lea.hbm %s2669_s2, 1024 }
  0x39   :  { %p2035_p10 = scmp.ne.s32.totalorder %s2669_s2, %s2034_s10  ;;  %p2038_p11 = scmp.lt.u32.totalorder %s2034_s10, %s2669_s2 }
  0x3b   :  { %p2040_p12 = pnand %p2038_p11, %p2035_p10 }
  0x3d   :  { %2043 = shalt.err (!%p2040_p12)
}
  0x3e   :  { %s2044_s0 = scalar_lea.vmem %s49_s30, 1024  ;;  %p2049_p0 = scmp.lt.s32.totalorder %s49_s30, %s49_s30 }
  0x3f   :  { %p2045_p13 = scmp.ne.s32.totalorder %s49_s30, %s2044_s0  ;;  %p2050_p1 = scmp.lt.s32.totalorder %s2044_s0, %s2044_s0 }
  0x41   :  { %p2051_p2 = por %p2050_p1, %p2049_p0 }
  0x43   :  { %p2052_p3 = pnand %p2051_p2, %p2045_p13 }
  0x45   :  { %2055 = shalt.err (!%p2052_p3)
}
  0x46   :  { %54 = dma.hbm_to_vmem [thread:$0]  %s2669_s2, 1024, %s49_s30, [#allocation7], %s2133_s19, %s2133_s19, %s2134_s20  }
  0x47   :  { %s2056_s23 = scalar_lea.hbm %s2672_s5, 1024 }
  0x48   :  { %p2057_p4 = scmp.ne.s32.totalorder %s2672_s5, %s2056_s23  ;;  %p2060_p5 = scmp.lt.u32.totalorder %s2056_s23, %s2672_s5 }
  0x4a   :  { %p2062_p6 = pnand %p2060_p5, %p2057_p4 }
  0x4c   :  { %2065 = shalt.err (!%p2062_p6)
}
  0x4d   :  { %s2066_s28 = scalar_lea.vmem %s75_s12, 1024  ;;  %p2071_p8 = scmp.lt.s32.totalorder %s75_s12, %s75_s12 }
  0x4e   :  { %p2067_p7 = scmp.ne.s32.totalorder %s75_s12, %s2066_s28  ;;  %p2072_p9 = scmp.lt.s32.totalorder %s2066_s28, %s2066_s28 }
  0x50   :  { %p2073_p10 = por %p2072_p9, %p2071_p8 }
  0x52   :  { %p2074_p11 = pnand %p2073_p10, %p2067_p7 }
  0x54   :  { %2077 = shalt.err (!%p2074_p11)
}
  0x55   :  { %80 = dma.hbm_to_vmem [thread:$0]  %s2672_s5, 1024, %s75_s12, [#allocation10], %s2133_s19, %s2133_s19, %s2134_s20  }
  0x56   :  { %s2141_s30 = smov [#allocation12]   ;;  %s2078_s10 = scalar_lea.hbm %s2674_s7, 1024 }
  0x57   :  { %s88_s11 = sshll.u32 %s2141_s30, 4  ;;  %p2079_p12 = scmp.ne.s32.totalorder %s2674_s7, %s2078_s10  ;;  %s89_s11 = int_to_ptr.vmem [resolvable:$true] %s88_s11 }
  0x58   :  { %p2082_p13 = scmp.lt.u32.totalorder %s2078_s10, %s2674_s7 }
  0x5a   :  { %p2084_p0 = pnand %p2082_p13, %p2079_p12 }
  0x5c   :  { %2087 = shalt.err (!%p2084_p0)
}
  0x5d   :  { %s2088_s0 = scalar_lea.vmem %s89_s11, 1024  ;;  %p2093_p2 = scmp.lt.s32.totalorder %s89_s11, %s89_s11 }
  0x5e   :  { %p2089_p1 = scmp.ne.s32.totalorder %s89_s11, %s2088_s0  ;;  %p2094_p3 = scmp.lt.s32.totalorder %s2088_s0, %s2088_s0 }
  0x60   :  { %p2095_p4 = por %p2094_p3, %p2093_p2 }
  0x62   :  { %p2096_p5 = pnand %p2095_p4, %p2089_p1 }
  0x64   :  { %2099 = shalt.err (!%p2096_p5)
}
  0x65   :  { %94 = dma.hbm_to_vmem [thread:$0]  %s2674_s7, 1024, %s89_s11, [#allocation13], %s2133_s19, %s2133_s19, %s2134_s20  }
  0x66   :  { %2122 = dma.done.wait [#allocation4], 1024  }
  0x67   :  { %2123 = vsyncadd [#allocation4], 4294966272 }
  0x68   :  { %2124 = dma.done.wait [#allocation7], 2048  }
  0x69   :  { %2125 = vsyncadd [#allocation7], 4294965248 }
  0x6a   :  { %2126 = dma.done.wait [#allocation10], 2048  }
  0x6b   :  { %2127 = vsyncadd [#allocation10], 4294965248 }
  0x6c   :  { %2128 = dma.done.wait [#allocation13], 1024  }
  0x6d   :  { %2129 = vsyncadd [#allocation13], 4294966272  ;;  %v2142_v0 = vmov 0.0   ;;  %v1892_v1 = vld [vmem:[#allocation6] sm:$0xff]   ;;  %v1893_v2 = vld [vmem:[#allocation6 + $0x8] sm:$0xff]   ;;  %vm2143_vm0 = vmmov 0  }
  0x6e   :  { %1555 = vmatprep.subr.bf16.mxu1 %v2142_v0  ;;  %1531 = vmatprep.subr.bf16.mxu0 %v1892_v1  ;;  %v1894_v3 = vld [vmem:[#allocation6 + $0x10] sm:$0xff]   ;;  %v1895_v4 = vld [vmem:[#allocation6 + $0x18] sm:$0xff]   ;;  %v149_v5 = vld [vmem:[#allocation3] sm:$0xff]  ;;  %s2144_s18 = smov [#allocation14]  }
  0x6f   :  { %1532 = vmatpush3.bf16.msra.mxu0 %v1892_v1  ;;  %v150_v6 = vld [vmem:[#allocation3 + $0x8] sm:$0xff]  ;;  %v2283_v8 = vld [vmem:[#allocation8] sm:$0xff]   ;;  %v2289_v12 = vld [vmem:[#allocation8 + $0x10] sm:$0xff]   ;;  %1571 = vmatprep.mubr.msk.bf16.mxu1 %vm2143_vm0, %v2142_v0  ;;  %s1316_s21 = sshll.u32 %s2144_s18, 4  ;;  %s1317_s21 = int_to_ptr.vmem [resolvable:$true] %s1316_s21 }
  0x70   :  { %1533 = vmatprep.subr.bf16.mxu0 %v1893_v2  ;;  %v157_v7 = vpack.c.bf16 %v150_v6, %v149_v5  ;;  %v1896_v9 = vld [vmem:[#allocation6 + $0x20] sm:$0xff]   ;;  %1556 = vmatpush3.bf16.msra.mxu1 %v2283_v8  ;;  %v2286_v10 = vld [vmem:[#allocation8 + $0x8] sm:$0xff]   ;;  %v1898_v13 = vld [vmem:[#allocation6 + $0x30] sm:$0xff]   ;;  %s2100_s22 = scalar_lea.vmem %s1317_s21, 128  ;;  %p2105_p7 = scmp.lt.s32.totalorder %s1317_s21, %s1317_s21 }
  0x71   :  { %1557 = vmatprep.subr.bf16.mxu1 %v2142_v0  ;;  %v1897_v11 = vld [vmem:[#allocation6 + $0x28] sm:$0xff]   ;;  %v2293_v14 = vld [vmem:[#allocation8 + $0x18] sm:$0xff]   ;;  %v151_v16 = vld [vmem:[#allocation3 + $0x10] sm:$0xff]  ;;  %p2101_p6 = scmp.ne.s32.totalorder %s1317_s21, %s2100_s22  ;;  %p2106_p8 = scmp.lt.s32.totalorder %s2100_s22, %s2100_s22 }
  0x72   :  { %1547 = vmatprep.mubr.bf16.mxu0 %v157_v7  ;;  %v1899_v15 = vld [vmem:[#allocation6 + $0x38] sm:$0xff]   ;;  %v2308_v19 = vld [vmem:[#allocation8 + $0x20] sm:$0xff]   ;;  %v2314_v20 = vld [vmem:[#allocation8 + $0x28] sm:$0xff]  }
  0x73   :  { %1534 = vmatpush3.bf16.msra.mxu0 %v1893_v2  ;;  %v152_v17 = vld [vmem:[#allocation3 + $0x18] sm:$0xff]  ;;  %v2319_v21 = vld [vmem:[#allocation8 + $0x30] sm:$0xff]   ;;  %v2337_v23 = vld [vmem:[%s2670_s3] ss:$0 sm:$0xff]  ;;  %p2107_p9 = por %p2106_p8, %p2105_p7 }
  0x74   :  { %1535 = vmatprep.subr.bf16.mxu0 %v1894_v3  ;;  %1558 = vmatpush3.bf16.msra.mxu1 %v2286_v10  ;;  %v158_v18 = vpack.c.bf16 %v152_v17, %v151_v16  ;;  %v2325_v22 = vld [vmem:[#allocation8 + $0x38] sm:$0xff]   ;;  %v153_v31 = vld [vmem:[#allocation3 + $0x20] sm:$0xff]  ;;  %v154_v32 = vld [vmem:[#allocation3 + $0x28] sm:$0xff] }
  0x75   :  { %1559 = vmatprep.subr.bf16.mxu1 %v2142_v0  ;;  %v159_v33 = vpack.c.bf16 %v154_v32, %v153_v31  ;;  %v155_v34 = vld [vmem:[#allocation3 + $0x30] sm:$0xff]  ;;  %v156_v35 = vld [vmem:[#allocation3 + $0x38] sm:$0xff]  ;;  %v2474_v31 = vld [vmem:[#allocation11 + $0x8] sm:$0xff]   ;;  %p2108_p10 = pnand %p2107_p9, %p2101_p6 }
  0x76   :  { %v160_v36 = vpack.c.bf16 %v156_v35, %v155_v34  ;;  %v2478_v32 = vld [vmem:[#allocation11 + $0x10] sm:$0xff]   ;;  %v2486_v34 = vld [vmem:[#allocation11 + $0x20] sm:$0xff]   ;;  %v2490_v35 = vld [vmem:[#allocation11 + $0x28] sm:$0xff]  }
  0x77   :  { %1536 = vmatpush3.bf16.msra.mxu0 %v1894_v3 }
  0x78   :  { %1537 = vmatprep.subr.bf16.mxu0 %v1895_v4  ;;  %1560 = vmatpush3.bf16.msra.mxu1 %v2289_v12 }
  0x79   :  { %1561 = vmatprep.subr.bf16.mxu1 %v2142_v0 }
  0x7b   :  { %1538 = vmatpush3.bf16.msra.mxu0 %v1895_v4 }
  0x7c   :  { %1539 = vmatprep.subr.bf16.mxu0 %v1896_v9  ;;  %1562 = vmatpush3.bf16.msra.mxu1 %v2293_v14 }
  0x7d   :  { %1563 = vmatprep.subr.bf16.mxu1 %v2142_v0 }
  0x7f   :  { %1540 = vmatpush3.bf16.msra.mxu0 %v1896_v9 }
  0x80   :  { %1541 = vmatprep.subr.bf16.mxu0 %v1897_v11  ;;  %1564 = vmatpush3.bf16.msra.mxu1 %v2308_v19 }
  0x81   :  { %1565 = vmatprep.subr.bf16.mxu1 %v2142_v0 }
  0x83   :  { %1542 = vmatpush3.bf16.msra.mxu0 %v1897_v11 }
  0x84   :  { %1543 = vmatprep.subr.bf16.mxu0 %v1898_v13  ;;  %1566 = vmatpush3.bf16.msra.mxu1 %v2314_v20 }
  0x85   :  { %1567 = vmatprep.subr.bf16.mxu1 %v2142_v0 }
  0x87   :  { %1544 = vmatpush3.bf16.msra.mxu0 %v1898_v13 }
  0x88   :  { %1545 = vmatprep.subr.bf16.mxu0 %v1899_v15  ;;  %1568 = vmatpush3.bf16.msra.mxu1 %v2319_v21 }
  0x89   :  { %1569 = vmatprep.subr.bf16.mxu1 %v2142_v0 }
  0x8b   :  { %1546 = vmatpush3.bf16.msra.mxu0 %v1899_v15 }
  0x8c   :  { %1575 = vmatprep.subr.bf16.mxu0 %v2142_v0  ;;  %1570 = vmatpush3.bf16.msra.mxu1 %v2325_v22 }
  0x8d   :  { %1595 = vmatprep.subr.bf16.mxu1 %v2142_v0 }
  0x8e   :  { %1548 = vmatmul.mubr.bf16.vlgmr.msra.gmra.mrb[0].mxu0 %v158_v18 }
  0x8f   :  { %1576 = vmatpush3.bf16.msra.mxu0 %v2283_v8  ;;  %1551 = vmatprep.mubr.bf16.mxu0 %v159_v33  ;;  %v2482_v33 = vld [vmem:[#allocation11 + $0x18] sm:$0xff]  }
  0x90   :  { %1577 = vmatprep.subr.bf16.mxu0 %v2142_v0 }
  0x93   :  { %1578 = vmatpush3.bf16.msra.mxu0 %v2286_v10 }
  0x94   :  { %1579 = vmatprep.subr.bf16.mxu0 %v2142_v0 }
  0x96   :  { %1552 = vmatmul.mubr.bf16.gmra.mrb[4].mxu0 %v160_v36  ;;  %v2494_v36 = vld [vmem:[#allocation11 + $0x30] sm:$0xff]  }
  0x97   :  { %1580 = vmatpush3.bf16.msra.mxu0 %v2289_v12  ;;  %1591 = vmatprep.mubr.msk.bf16.mxu0 %vm2143_vm0, %v2142_v0 }
  0x98   :  { %1581 = vmatprep.subr.bf16.mxu0 %v2142_v0 }
  0x9b   :  { %1582 = vmatpush3.bf16.msra.mxu0 %v2293_v14 }
  0x9c   :  { %1583 = vmatprep.subr.bf16.mxu0 %v2142_v0 }
  0x9f   :  { %1584 = vmatpush3.bf16.msra.mxu0 %v2308_v19 }
  0xa0   :  { %1585 = vmatprep.subr.bf16.mxu0 %v2142_v0 }
  0xa3   :  { %1586 = vmatpush3.bf16.msra.mxu0 %v2314_v20 }
  0xa4   :  { %1587 = vmatprep.subr.bf16.mxu0 %v2142_v0 }
  0xa7   :  { %1588 = vmatpush3.bf16.msra.mxu0 %v2319_v21 }
  0xa8   :  { %1589 = vmatprep.subr.bf16.mxu0 %v2142_v0 }
  0xab   :  { %1590 = vmatpush3.bf16.msra.mxu0 %v2325_v22 }
  0xac   :  { %1615 = vmatprep.subr.bf16.mxu0 %v2142_v0 }
 0x161   :  { %v2339_v24 = vpop.f32.mrb[0].mxu0 }
 0x162   :  { %v249_v25 = vpop.f32.mrb[1].mxu0  ;;  %v258_v49 = vadd.f32 %v2339_v24, %v2337_v23  ;;  %v1912_v24 = vld [vmem:[#allocation9 + $0x20] sm:$0xff]  }
 0x163   :  { %v250_v26 = vadd.f32 %v2337_v23, %v249_v25  ;;  %v2342_v27 = vpop.f32.mrb[2].mxu0  ;;  %v1913_v25 = vld [vmem:[#allocation9 + $0x28] sm:$0xff]  }
 0x164   :  { %v252_v28 = vpop.f32.mrb[3].mxu0  ;;  %v261_v57 = vadd.f32 %v2342_v27, %v2337_v23  ;;  %v1915_v27 = vld [vmem:[#allocation9 + $0x38] sm:$0xff]  }
 0x165   :  { %1932 = vtanh.f32 %v250_v26  ;;  %v253_v37 = vadd.f32 %v2337_v23, %v252_v28  ;;  %v1914_v26 = vld [vmem:[#allocation9 + $0x30] sm:$0xff]  }
 0x169   :  { %v2391_v45 = vpop.f32.mrb[4].mxu0 }
 0x16a   :  { %v265_v46 = vpop.f32.mrb[5].mxu0 }
 0x16b   :  { %v2393_v47 = vpop.f32.mrb[6].mxu0  ;;  %v266_v2 = vadd.f32 %v2337_v23, %v265_v46 }
 0x16c   :  { %v2395_v48 = vpop.f32.mrb[7].mxu0 }
 0x16f   :  { %v2344_v29 = vpop.eup %1932 }
 0x170   :  { %v291_v30 = vpack.c.bf16 %v2344_v29, %v2344_v29 }
 0x172   :  { %1572 = vmatmul.mubr.bf16.vlgmr.msra.gmra.mrb[0].mxu1 %v291_v30  ;;  %v2470_v30 = vld [vmem:[#allocation11] sm:$0xff]  }
 0x173   :  { %1596 = vmatpush3.bf16.msra.mxu1 %v2283_v8  ;;  %1611 = vmatprep.mubr.msk.bf16.mxu1 %vm2143_vm0, %v2142_v0 }
 0x174   :  { %1597 = vmatprep.subr.bf16.mxu1 %v2142_v0 }
 0x177   :  { %1598 = vmatpush3.bf16.msra.mxu1 %v2286_v10 }
 0x178   :  { %1599 = vmatprep.subr.bf16.mxu1 %v2142_v0 }
 0x17b   :  { %1600 = vmatpush3.bf16.msra.mxu1 %v2289_v12 }
 0x17c   :  { %1601 = vmatprep.subr.bf16.mxu1 %v2142_v0 }
 0x17f   :  { %1602 = vmatpush3.bf16.msra.mxu1 %v2293_v14 }
 0x180   :  { %1603 = vmatprep.subr.bf16.mxu1 %v2142_v0 }
 0x183   :  { %1604 = vmatpush3.bf16.msra.mxu1 %v2308_v19 }
 0x184   :  { %1605 = vmatprep.subr.bf16.mxu1 %v2142_v0 }
 0x187   :  { %1606 = vmatpush3.bf16.msra.mxu1 %v2314_v20 }
 0x188   :  { %1607 = vmatprep.subr.bf16.mxu1 %v2142_v0 }
 0x18b   :  { %1608 = vmatpush3.bf16.msra.mxu1 %v2319_v21 }
 0x18c   :  { %1609 = vmatprep.subr.bf16.mxu1 %v2142_v0 }
 0x18f   :  { %1610 = vmatpush3.bf16.msra.mxu1 %v2325_v22 }
 0x190   :  { %1635 = vmatprep.subr.bf16.mxu1 %v2142_v0 }
 0x245   :  { %v374_v38 = vpop.f32.mrb[0].mxu1 }
 0x246   :  { %v382_v39 = vadd.f32 %v374_v38, %v253_v37  ;;  %v1573_v40 = vpop.f32.mrb[1].mxu1  ;;  %v2498_v37 = vld [vmem:[#allocation11 + $0x38] sm:$0xff]   ;;  %v274_v38 = vadd.f32 %v2391_v45, %v2337_v23  ;;  %v2517_v45 = vld [vmem:[%s2673_s6] ss:$0 sm:$0xff] }
 0x247   :  { %v377_v41 = vpop.f32.mrb[2].mxu1 }
 0x248   :  { %1934 = vtanh.f32 %v382_v39  ;;  %v1574_v42 = vpop.f32.mrb[3].mxu1 }
 0x252   :  { %v2369_v43 = vpop.eup %1934 }
 0x253   :  { %v385_v44 = vpack.c.bf16 %v2369_v43, %v2369_v43 }
 0x255   :  { %1592 = vmatmul.mubr.bf16.vlgmr.msra.gmra.mrb[8].mxu0 %v385_v44 }
 0x256   :  { %1616 = vmatpush3.bf16.msra.mxu0 %v2283_v8  ;;  %1631 = vmatprep.mubr.msk.bf16.mxu0 %vm2143_vm0, %v2142_v0 }
 0x257   :  { %1617 = vmatprep.subr.bf16.mxu0 %v2142_v0 }
 0x25a   :  { %1618 = vmatpush3.bf16.msra.mxu0 %v2286_v10 }
 0x25b   :  { %1619 = vmatprep.subr.bf16.mxu0 %v2142_v0 }
 0x25e   :  { %1620 = vmatpush3.bf16.msra.mxu0 %v2289_v12 }
 0x25f   :  { %1621 = vmatprep.subr.bf16.mxu0 %v2142_v0 }
 0x262   :  { %1622 = vmatpush3.bf16.msra.mxu0 %v2293_v14 }
 0x263   :  { %1623 = vmatprep.subr.bf16.mxu0 %v2142_v0 }
 0x266   :  { %1624 = vmatpush3.bf16.msra.mxu0 %v2308_v19 }
 0x267   :  { %1625 = vmatprep.subr.bf16.mxu0 %v2142_v0 }
 0x26a   :  { %1626 = vmatpush3.bf16.msra.mxu0 %v2314_v20 }
 0x26b   :  { %1627 = vmatprep.subr.bf16.mxu0 %v2142_v0 }
 0x26e   :  { %1628 = vmatpush3.bf16.msra.mxu0 %v2319_v21 }
 0x26f   :  { %1629 = vmatprep.subr.bf16.mxu0 %v2142_v0 }
 0x272   :  { %1630 = vmatpush3.bf16.msra.mxu0 %v2325_v22 }
 0x273   :  { %1655 = vmatprep.subr.bf16.mxu0 %v2142_v0 }
 0x328   :  { %v420_v50 = vpop.f32.mrb[8].mxu0 }
 0x329   :  { %v428_v51 = vadd.f32 %v420_v50, %v258_v49  ;;  %v1593_v52 = vpop.f32.mrb[9].mxu0 }
 0x32a   :  { %v423_v53 = vpop.f32.mrb[10].mxu0 }
 0x32b   :  { %1936 = vtanh.f32 %v428_v51  ;;  %v1594_v54 = vpop.f32.mrb[11].mxu0 }
 0x335   :  { %v2399_v55 = vpop.eup %1936 }
 0x336   :  { %v431_v56 = vpack.c.bf16 %v2399_v55, %v2399_v55 }
 0x338   :  { %1612 = vmatmul.mubr.bf16.vlgmr.msra.gmra.mrb[4].mxu1 %v431_v56 }
 0x339   :  { %1636 = vmatpush3.bf16.msra.mxu1 %v2283_v8  ;;  %1651 = vmatprep.mubr.msk.bf16.mxu1 %vm2143_vm0, %v2142_v0 }
 0x33a   :  { %1637 = vmatprep.subr.bf16.mxu1 %v2142_v0 }
 0x33d   :  { %1638 = vmatpush3.bf16.msra.mxu1 %v2286_v10 }
 0x33e   :  { %1639 = vmatprep.subr.bf16.mxu1 %v2142_v0 }
 0x341   :  { %1640 = vmatpush3.bf16.msra.mxu1 %v2289_v12 }
 0x342   :  { %1641 = vmatprep.subr.bf16.mxu1 %v2142_v0 }
 0x345   :  { %1642 = vmatpush3.bf16.msra.mxu1 %v2293_v14 }
 0x346   :  { %1643 = vmatprep.subr.bf16.mxu1 %v2142_v0 }
 0x349   :  { %1644 = vmatpush3.bf16.msra.mxu1 %v2308_v19 }
 0x34a   :  { %1645 = vmatprep.subr.bf16.mxu1 %v2142_v0 }
 0x34d   :  { %1646 = vmatpush3.bf16.msra.mxu1 %v2314_v20 }
 0x34e   :  { %1647 = vmatprep.subr.bf16.mxu1 %v2142_v0 }
 0x351   :  { %1648 = vmatpush3.bf16.msra.mxu1 %v2319_v21 }
 0x352   :  { %1649 = vmatprep.subr.bf16.mxu1 %v2142_v0 }
 0x355   :  { %1650 = vmatpush3.bf16.msra.mxu1 %v2325_v22 }
 0x356   :  { %1675 = vmatprep.subr.bf16.mxu1 %v2142_v0 }
 0x40b   :  { %v466_v58 = vpop.f32.mrb[4].mxu1 }
 0x40c   :  { %v474_v59 = vadd.f32 %v466_v58, %v261_v57  ;;  %v1613_v60 = vpop.f32.mrb[5].mxu1 }
 0x40d   :  { %v469_v61 = vpop.f32.mrb[6].mxu1 }
 0x40e   :  { %1938 = vtanh.f32 %v474_v59  ;;  %v1614_v62 = vpop.f32.mrb[7].mxu1 }
 0x418   :  { %v2423_v63 = vpop.eup %1938 }
 0x419   :  { %v477_v1 = vpack.c.bf16 %v2423_v63, %v2423_v63  ;;  %v703_v28 = vpack.c.bf16 %v2423_v63, %v2399_v55  ;;  %v277_v55 = vadd.f32 %v2393_v47, %v2337_v23 }
 0x41b   :  { %1632 = vmatmul.mubr.bf16.vlgmr.msra.gmra.mrb[12].mxu0 %v477_v1 }
 0x41c   :  { %1656 = vmatpush3.bf16.msra.mxu0 %v2283_v8  ;;  %1671 = vmatprep.mubr.msk.bf16.mxu0 %vm2143_vm0, %v2142_v0 }
 0x41d   :  { %1657 = vmatprep.subr.bf16.mxu0 %v2142_v0 }
 0x420   :  { %1658 = vmatpush3.bf16.msra.mxu0 %v2286_v10 }
 0x421   :  { %1659 = vmatprep.subr.bf16.mxu0 %v2142_v0 }
 0x424   :  { %1660 = vmatpush3.bf16.msra.mxu0 %v2289_v12 }
 0x425   :  { %1661 = vmatprep.subr.bf16.mxu0 %v2142_v0 }
 0x428   :  { %1662 = vmatpush3.bf16.msra.mxu0 %v2293_v14 }
 0x429   :  { %1663 = vmatprep.subr.bf16.mxu0 %v2142_v0 }
 0x42c   :  { %1664 = vmatpush3.bf16.msra.mxu0 %v2308_v19 }
 0x42d   :  { %1665 = vmatprep.subr.bf16.mxu0 %v2142_v0 }
 0x430   :  { %1666 = vmatpush3.bf16.msra.mxu0 %v2314_v20 }
 0x431   :  { %1667 = vmatprep.subr.bf16.mxu0 %v2142_v0 }
 0x434   :  { %1668 = vmatpush3.bf16.msra.mxu0 %v2319_v21 }
 0x435   :  { %1669 = vmatprep.subr.bf16.mxu0 %v2142_v0 }
 0x438   :  { %1670 = vmatpush3.bf16.msra.mxu0 %v2325_v22 }
 0x4ee   :  { %v512_v3 = vpop.f32.mrb[12].mxu0 }
 0x4ef   :  { %v520_v4 = vadd.f32 %v512_v3, %v266_v2  ;;  %v1633_v5 = vpop.f32.mrb[13].mxu0 }
 0x4f0   :  { %v515_v6 = vpop.f32.mrb[14].mxu0 }
 0x4f1   :  { %1940 = vtanh.f32 %v520_v4  ;;  %v1634_v7 = vpop.f32.mrb[15].mxu0 }
 0x4fb   :  { %v1941_v9 = vpop.eup %1940 }
 0x4fc   :  { %v523_v11 = vpack.c.bf16 %v1941_v9, %v1941_v9 }
 0x4fe   :  { %1652 = vmatmul.mubr.bf16.vlgmr.msra.gmra.mrb[8].mxu1 %v523_v11 }
 0x4ff   :  { %1676 = vmatpush3.bf16.msra.mxu1 %v2283_v8  ;;  %1691 = vmatprep.mubr.msk.bf16.mxu1 %vm2143_vm0, %v2142_v0  ;;  %v1908_v8 = vld [vmem:[#allocation9] sm:$0xff]  }
 0x500   :  { %1677 = vmatprep.subr.bf16.mxu1 %v2142_v0  ;;  %1695 = vmatprep.subr.bf16.mxu0 %v1908_v8 }
 0x503   :  { %1678 = vmatpush3.bf16.msra.mxu1 %v2286_v10  ;;  %v269_v10 = vadd.f32 %v2337_v23, %v2395_v48 }
 0x504   :  { %1679 = vmatprep.subr.bf16.mxu1 %v2142_v0 }
 0x507   :  { %1680 = vmatpush3.bf16.msra.mxu1 %v2289_v12 }
 0x508   :  { %1681 = vmatprep.subr.bf16.mxu1 %v2142_v0 }
 0x50b   :  { %1682 = vmatpush3.bf16.msra.mxu1 %v2293_v14 }
 0x50c   :  { %1683 = vmatprep.subr.bf16.mxu1 %v2142_v0 }
 0x50f   :  { %1684 = vmatpush3.bf16.msra.mxu1 %v2308_v19  ;;  %v1909_v19 = vld [vmem:[#allocation9 + $0x8] sm:$0xff]  }
 0x510   :  { %1685 = vmatprep.subr.bf16.mxu1 %v2142_v0 }
 0x513   :  { %1686 = vmatpush3.bf16.msra.mxu1 %v2314_v20  ;;  %v702_v20 = vpack.c.bf16 %v2369_v43, %v2344_v29 }
 0x514   :  { %1687 = vmatprep.subr.bf16.mxu1 %v2142_v0 }
 0x517   :  { %1688 = vmatpush3.bf16.msra.mxu1 %v2319_v21  ;;  %v1910_v21 = vld [vmem:[#allocation9 + $0x10] sm:$0xff]  }
 0x518   :  { %1689 = vmatprep.subr.bf16.mxu1 %v2142_v0 }
 0x51b   :  { %1690 = vmatpush3.bf16.msra.mxu1 %v2325_v22  ;;  %v1911_v22 = vld [vmem:[#allocation9 + $0x18] sm:$0xff]  }
 0x51c   :  { %1719 = vmatprep.subr.bf16.mxu1 %v2142_v0 }
 0x5d1   :  { %v558_v12 = vpop.f32.mrb[8].mxu1 }
 0x5d2   :  { %v566_v13 = vadd.f32 %v558_v12, %v269_v10  ;;  %v1653_v14 = vpop.f32.mrb[9].mxu1 }
 0x5d3   :  { %v561_v15 = vpop.f32.mrb[10].mxu1 }
 0x5d4   :  { %1942 = vtanh.f32 %v566_v13  ;;  %v1654_v16 = vpop.f32.mrb[11].mxu1 }
 0x5de   :  { %v1943_v17 = vpop.eup %1942 }
 0x5df   :  { %v569_v18 = vpack.c.bf16 %v1943_v17, %v1943_v17  ;;  %v704_v29 = vpack.c.bf16 %v1943_v17, %v1941_v9 }
 0x5e1   :  { %1672 = vmatmul.mubr.bf16.vlgmr.msra.gmra.mrb[16].mxu0 %v569_v18 }
 0x5e2   :  { %1696 = vmatpush3.bf16.msra.mxu0 %v1908_v8  ;;  %1711 = vmatprep.mubr.bf16.mxu0 %v702_v20 }
 0x5e3   :  { %1697 = vmatprep.subr.bf16.mxu0 %v1909_v19 }
 0x5e6   :  { %1698 = vmatpush3.bf16.msra.mxu0 %v1909_v19 }
 0x5e7   :  { %1699 = vmatprep.subr.bf16.mxu0 %v1910_v21 }
 0x5ea   :  { %1700 = vmatpush3.bf16.msra.mxu0 %v1910_v21 }
 0x5eb   :  { %1701 = vmatprep.subr.bf16.mxu0 %v1911_v22 }
 0x5ee   :  { %1702 = vmatpush3.bf16.msra.mxu0 %v1911_v22 }
 0x5ef   :  { %1703 = vmatprep.subr.bf16.mxu0 %v1912_v24 }
 0x5f2   :  { %1704 = vmatpush3.bf16.msra.mxu0 %v1912_v24 }
 0x5f3   :  { %1705 = vmatprep.subr.bf16.mxu0 %v1913_v25 }
 0x5f6   :  { %1706 = vmatpush3.bf16.msra.mxu0 %v1913_v25 }
 0x5f7   :  { %1707 = vmatprep.subr.bf16.mxu0 %v1914_v26 }
 0x5fa   :  { %1708 = vmatpush3.bf16.msra.mxu0 %v1914_v26 }
 0x5fb   :  { %1709 = vmatprep.subr.bf16.mxu0 %v1915_v27 }
 0x5fe   :  { %1710 = vmatpush3.bf16.msra.mxu0 %v1915_v27 }
 0x5ff   :  { %1739 = vmatprep.subr.bf16.mxu0 %v2142_v0 }
 0x601   :  { %1712 = vmatmul.mubr.bf16.vlgmr.msra.gmra.mrb[20].mxu0 %v703_v28 }
 0x602   :  { %1715 = vmatprep.mubr.bf16.mxu0 %v704_v29  ;;  %1740 = vmatpush3.bf16.msra.mxu0 %v2470_v30 }
 0x603   :  { %1741 = vmatprep.subr.bf16.mxu0 %v2142_v0 }
 0x606   :  { %1742 = vmatpush3.bf16.msra.mxu0 %v2474_v31 }
 0x607   :  { %1743 = vmatprep.subr.bf16.mxu0 %v2142_v0 }
 0x60a   :  { %1744 = vmatpush3.bf16.msra.mxu0 %v2478_v32 }
 0x60b   :  { %1745 = vmatprep.subr.bf16.mxu0 %v2142_v0 }
 0x60e   :  { %1746 = vmatpush3.bf16.msra.mxu0 %v2482_v33 }
 0x60f   :  { %1747 = vmatprep.subr.bf16.mxu0 %v2142_v0 }
 0x612   :  { %1748 = vmatpush3.bf16.msra.mxu0 %v2486_v34 }
 0x613   :  { %1749 = vmatprep.subr.bf16.mxu0 %v2142_v0 }
 0x616   :  { %1750 = vmatpush3.bf16.msra.mxu0 %v2490_v35 }
 0x617   :  { %1751 = vmatprep.subr.bf16.mxu0 %v2142_v0 }
 0x61a   :  { %1752 = vmatpush3.bf16.msra.mxu0 %v2494_v36 }
 0x61b   :  { %1753 = vmatprep.subr.bf16.mxu0 %v2142_v0 }
 0x61e   :  { %1754 = vmatpush3.bf16.msra.mxu0 %v2498_v37 }
 0x61f   :  { %1779 = vmatprep.subr.bf16.mxu0 %v2142_v0 }
 0x6b4   :  { %v604_v39 = vpop.f32.mrb[16].mxu0 }
 0x6b5   :  { %v612_v40 = vadd.f32 %v604_v39, %v274_v38  ;;  %v1673_v41 = vpop.f32.mrb[17].mxu0 }
 0x6b6   :  { %v607_v42 = vpop.f32.mrb[18].mxu0 }
 0x6b7   :  { %1944 = vtanh.f32 %v612_v40  ;;  %v1674_v43 = vpop.f32.mrb[19].mxu0 }
 0x6c1   :  { %v1945_v44 = vpop.eup %1944 }
 0x6c2   :  { %v615_v46 = vpack.c.bf16 %v1945_v44, %v1945_v44 }
 0x6c4   :  { %1692 = vmatmul.mubr.bf16.vlgmr.msra.gmra.mrb[12].mxu1 %v615_v46 }
 0x6c5   :  { %1720 = vmatpush3.bf16.msra.mxu1 %v2470_v30  ;;  %1735 = vmatprep.mubr.msk.bf16.mxu1 %vm2143_vm0, %v2142_v0 }
 0x6c6   :  { %1721 = vmatprep.subr.bf16.mxu1 %v2142_v0 }
 0x6c9   :  { %1722 = vmatpush3.bf16.msra.mxu1 %v2474_v31 }
 0x6ca   :  { %1723 = vmatprep.subr.bf16.mxu1 %v2142_v0 }
 0x6cd   :  { %1724 = vmatpush3.bf16.msra.mxu1 %v2478_v32 }
 0x6ce   :  { %1725 = vmatprep.subr.bf16.mxu1 %v2142_v0 }
 0x6d1   :  { %1726 = vmatpush3.bf16.msra.mxu1 %v2482_v33 }
 0x6d2   :  { %1727 = vmatprep.subr.bf16.mxu1 %v2142_v0 }
 0x6d4   :  { %v2519_v48 = vpop.f32.mrb[20].mxu0 }
 0x6d5   :  { %v794_v49 = vpop.f32.mrb[21].mxu0  ;;  %1728 = vmatpush3.bf16.msra.mxu1 %v2486_v34  ;;  %v803_v8 = vadd.f32 %v2519_v48, %v2517_v45  ;;  %v1927_v48 = vld [vmem:[#allocation12 + $0x18] sm:$0xff]  }
 0x6d6   :  { %v795_v50 = vadd.f32 %v2517_v45, %v794_v49  ;;  %v2523_v51 = vpop.f32.mrb[22].mxu0  ;;  %1729 = vmatprep.subr.bf16.mxu1 %v2142_v0 }
 0x6d7   :  { %v797_v52 = vpop.f32.mrb[23].mxu0  ;;  %v806_v18 = vadd.f32 %v2523_v51, %v2517_v45 }
 0x6d8   :  { %1946 = vtanh.f32 %v795_v50  ;;  %v798_v63 = vadd.f32 %v2517_v45, %v797_v52 }
 0x6d9   :  { %1730 = vmatpush3.bf16.msra.mxu1 %v2490_v35 }
 0x6da   :  { %1731 = vmatprep.subr.bf16.mxu1 %v2142_v0 }
 0x6dd   :  { %1732 = vmatpush3.bf16.msra.mxu1 %v2494_v36 }
 0x6de   :  { %1733 = vmatprep.subr.bf16.mxu1 %v2142_v0 }
 0x6e1   :  { %1734 = vmatpush3.bf16.msra.mxu1 %v2498_v37 }
 0x6e2   :  { %v1947_v53 = vpop.eup %1946  ;;  %1759 = vmatprep.subr.bf16.mxu1 %v2142_v0 }
 0x6e3   :  { %v835_v54 = vpack.c.bf16 %v1947_v53, %v1947_v53 }
 0x6e5   :  { %1736 = vmatmul.mubr.bf16.vlgmr.msra.gmra.mrb[16].mxu1 %v835_v54 }
 0x6e6   :  { %1760 = vmatpush3.bf16.msra.mxu1 %v2470_v30  ;;  %1775 = vmatprep.mubr.msk.bf16.mxu1 %vm2143_vm0, %v2142_v0 }
 0x6e7   :  { %1761 = vmatprep.subr.bf16.mxu1 %v2142_v0 }
 0x6ea   :  { %1762 = vmatpush3.bf16.msra.mxu1 %v2474_v31 }
 0x6eb   :  { %1763 = vmatprep.subr.bf16.mxu1 %v2142_v0 }
 0x6ee   :  { %1764 = vmatpush3.bf16.msra.mxu1 %v2478_v32 }
 0x6ef   :  { %1765 = vmatprep.subr.bf16.mxu1 %v2142_v0 }
 0x6f2   :  { %1766 = vmatpush3.bf16.msra.mxu1 %v2482_v33 }
 0x6f3   :  { %1767 = vmatprep.subr.bf16.mxu1 %v2142_v0 }
 0x6f6   :  { %1768 = vmatpush3.bf16.msra.mxu1 %v2486_v34 }
 0x6f7   :  { %1769 = vmatprep.subr.bf16.mxu1 %v2142_v0 }
 0x6fa   :  { %1770 = vmatpush3.bf16.msra.mxu1 %v2490_v35 }
 0x6fb   :  { %1771 = vmatprep.subr.bf16.mxu1 %v2142_v0 }
 0x6fe   :  { %1772 = vmatpush3.bf16.msra.mxu1 %v2494_v36 }
 0x6ff   :  { %1773 = vmatprep.subr.bf16.mxu1 %v2142_v0 }
 0x702   :  { %1774 = vmatpush3.bf16.msra.mxu1 %v2498_v37 }
 0x703   :  { %1799 = vmatprep.subr.bf16.mxu1 %v2142_v0 }
 0x797   :  { %v650_v56 = vpop.f32.mrb[12].mxu1 }
 0x798   :  { %v658_v57 = vadd.f32 %v650_v56, %v277_v55  ;;  %v1693_v58 = vpop.f32.mrb[13].mxu1 }
 0x799   :  { %v653_v59 = vpop.f32.mrb[14].mxu1  ;;  %v1929_v58 = vld [vmem:[#allocation12 + $0x28] sm:$0xff]  }
 0x79a   :  { %1948 = vtanh.f32 %v658_v57  ;;  %v1694_v60 = vpop.f32.mrb[15].mxu1  ;;  %v1928_v57 = vld [vmem:[#allocation12 + $0x20] sm:$0xff]   ;;  %v1930_v59 = vld [vmem:[#allocation12 + $0x30] sm:$0xff]  }
 0x79b   :  { %v1931_v60 = vld [vmem:[#allocation12 + $0x38] sm:$0xff]  }
 0x7a4   :  { %v1949_v61 = vpop.eup %1948 }
 0x7a5   :  { %v705_v62 = vpack.c.bf16 %v1949_v61, %v1945_v44 }
 0x7a7   :  { %1716 = vmatmul.mubr.bf16.gmra.mrb[24].mxu0 %v705_v62 }
 0x7a8   :  { %1755 = vmatprep.mubr.msk.bf16.mxu0 %vm2143_vm0, %v2142_v0 }
 0x7b8   :  { %v918_v1 = vpop.f32.mrb[16].mxu1 }
 0x7b9   :  { %v925_v2 = vadd.f32 %v918_v1, %v798_v63  ;;  %v1737_v3 = vpop.f32.mrb[17].mxu1 }
 0x7ba   :  { %v921_v4 = vpop.f32.mrb[18].mxu1 }
 0x7bb   :  { %1950 = vtanh.f32 %v925_v2  ;;  %v1738_v23 = vpop.f32.mrb[19].mxu1 }
 0x7c5   :  { %v1951_v47 = vpop.eup %1950 }
 0x7c6   :  { %v927_v5 = vpack.c.bf16 %v1951_v47, %v1951_v47  ;;  %v1362_v47 = vld [vmem:[%s2675_s8] ss:$0 sm:$0xff] }
 0x7c8   :  { %1756 = vmatmul.mubr.bf16.vlgmr.msra.gmra.mrb[28].mxu0 %v927_v5 }
 0x7c9   :  { %1780 = vmatpush3.bf16.msra.mxu0 %v2470_v30  ;;  %1795 = vmatprep.mubr.msk.bf16.mxu0 %vm2143_vm0, %v2142_v0 }
 0x7ca   :  { %1781 = vmatprep.subr.bf16.mxu0 %v2142_v0 }
 0x7cd   :  { %1782 = vmatpush3.bf16.msra.mxu0 %v2474_v31 }
 0x7ce   :  { %1783 = vmatprep.subr.bf16.mxu0 %v2142_v0 }
 0x7d1   :  { %1784 = vmatpush3.bf16.msra.mxu0 %v2478_v32 }
 0x7d2   :  { %1785 = vmatprep.subr.bf16.mxu0 %v2142_v0 }
 0x7d5   :  { %1786 = vmatpush3.bf16.msra.mxu0 %v2482_v33 }
 0x7d6   :  { %1787 = vmatprep.subr.bf16.mxu0 %v2142_v0 }
 0x7d9   :  { %1788 = vmatpush3.bf16.msra.mxu0 %v2486_v34 }
 0x7da   :  { %1789 = vmatprep.subr.bf16.mxu0 %v2142_v0 }
 0x7dd   :  { %1790 = vmatpush3.bf16.msra.mxu0 %v2490_v35 }
 0x7de   :  { %1791 = vmatprep.subr.bf16.mxu0 %v2142_v0 }
 0x7e1   :  { %1792 = vmatpush3.bf16.msra.mxu0 %v2494_v36 }
 0x7e2   :  { %1793 = vmatprep.subr.bf16.mxu0 %v2142_v0 }
 0x7e5   :  { %1794 = vmatpush3.bf16.msra.mxu0 %v2498_v37 }
 0x7e6   :  { %1819 = vmatprep.subr.bf16.mxu0 %v2142_v0 }
 0x87a   :  { %v2573_v6 = vpop.f32.mrb[24].mxu0 }
 0x87b   :  { %v810_v7 = vpop.f32.mrb[25].mxu0  ;;  %v819_v49 = vadd.f32 %v2573_v6, %v2517_v45 }
 0x87c   :  { %v2575_v9 = vpop.f32.mrb[26].mxu0  ;;  %v811_v27 = vadd.f32 %v2517_v45, %v810_v7 }
 0x87d   :  { %v2577_v11 = vpop.f32.mrb[27].mxu0  ;;  %v822_v61 = vadd.f32 %v2575_v9, %v2517_v45 }
 0x89b   :  { %v962_v10 = vpop.f32.mrb[28].mxu0 }
 0x89c   :  { %v969_v12 = vadd.f32 %v962_v10, %v803_v8  ;;  %v1757_v13 = vpop.f32.mrb[29].mxu0 }
 0x89d   :  { %v965_v14 = vpop.f32.mrb[30].mxu0 }
 0x89e   :  { %1952 = vtanh.f32 %v969_v12  ;;  %v1758_v15 = vpop.f32.mrb[31].mxu0 }
 0x8a8   :  { %v1953_v16 = vpop.eup %1952 }
 0x8a9   :  { %v971_v17 = vpack.c.bf16 %v1953_v16, %v1953_v16 }
 0x8ab   :  { %1776 = vmatmul.mubr.bf16.vlgmr.msra.gmra.mrb[20].mxu1 %v971_v17 }
 0x8ac   :  { %1800 = vmatpush3.bf16.msra.mxu1 %v2470_v30  ;;  %1815 = vmatprep.mubr.msk.bf16.mxu1 %vm2143_vm0, %v2142_v0 }
 0x8ad   :  { %1801 = vmatprep.subr.bf16.mxu1 %v2142_v0 }
 0x8b0   :  { %1802 = vmatpush3.bf16.msra.mxu1 %v2474_v31 }
 0x8b1   :  { %1803 = vmatprep.subr.bf16.mxu1 %v2142_v0 }
 0x8b4   :  { %1804 = vmatpush3.bf16.msra.mxu1 %v2478_v32 }
 0x8b5   :  { %1805 = vmatprep.subr.bf16.mxu1 %v2142_v0 }
 0x8b8   :  { %1806 = vmatpush3.bf16.msra.mxu1 %v2482_v33 }
 0x8b9   :  { %1807 = vmatprep.subr.bf16.mxu1 %v2142_v0 }
 0x8bc   :  { %1808 = vmatpush3.bf16.msra.mxu1 %v2486_v34 }
 0x8bd   :  { %1809 = vmatprep.subr.bf16.mxu1 %v2142_v0 }
 0x8c0   :  { %1810 = vmatpush3.bf16.msra.mxu1 %v2490_v35 }
 0x8c1   :  { %1811 = vmatprep.subr.bf16.mxu1 %v2142_v0 }
 0x8c4   :  { %1812 = vmatpush3.bf16.msra.mxu1 %v2494_v36 }
 0x8c5   :  { %1813 = vmatprep.subr.bf16.mxu1 %v2142_v0 }
 0x8c8   :  { %1814 = vmatpush3.bf16.msra.mxu1 %v2498_v37 }
 0x8c9   :  { %1839 = vmatprep.subr.bf16.mxu1 %v2142_v0 }
 0x97e   :  { %v1006_v19 = vpop.f32.mrb[20].mxu1 }
 0x97f   :  { %v1013_v20 = vadd.f32 %v1006_v19, %v806_v18  ;;  %v1777_v21 = vpop.f32.mrb[21].mxu1 }
 0x980   :  { %v1009_v22 = vpop.f32.mrb[22].mxu1 }
 0x981   :  { %1954 = vtanh.f32 %v1013_v20  ;;  %v1778_v24 = vpop.f32.mrb[23].mxu1 }
 0x98b   :  { %v1955_v25 = vpop.eup %1954 }
 0x98c   :  { %v1015_v26 = vpack.c.bf16 %v1955_v25, %v1955_v25 }
 0x98e   :  { %1796 = vmatmul.mubr.bf16.vlgmr.msra.gmra.mrb[32].mxu0 %v1015_v26 }
 0x98f   :  { %1820 = vmatpush3.bf16.msra.mxu0 %v2470_v30  ;;  %1835 = vmatprep.mubr.msk.bf16.mxu0 %vm2143_vm0, %v2142_v0 }
 0x990   :  { %1821 = vmatprep.subr.bf16.mxu0 %v2142_v0 }
 0x993   :  { %1822 = vmatpush3.bf16.msra.mxu0 %v2474_v31 }
 0x994   :  { %1823 = vmatprep.subr.bf16.mxu0 %v2142_v0 }
 0x997   :  { %1824 = vmatpush3.bf16.msra.mxu0 %v2478_v32 }
 0x998   :  { %1825 = vmatprep.subr.bf16.mxu0 %v2142_v0 }
 0x99b   :  { %1826 = vmatpush3.bf16.msra.mxu0 %v2482_v33 }
 0x99c   :  { %1827 = vmatprep.subr.bf16.mxu0 %v2142_v0 }
 0x99f   :  { %1828 = vmatpush3.bf16.msra.mxu0 %v2486_v34 }
 0x9a0   :  { %1829 = vmatprep.subr.bf16.mxu0 %v2142_v0 }
 0x9a3   :  { %1830 = vmatpush3.bf16.msra.mxu0 %v2490_v35 }
 0x9a4   :  { %1831 = vmatprep.subr.bf16.mxu0 %v2142_v0 }
 0x9a7   :  { %1832 = vmatpush3.bf16.msra.mxu0 %v2494_v36 }
 0x9a8   :  { %1833 = vmatprep.subr.bf16.mxu0 %v2142_v0 }
 0x9ab   :  { %1834 = vmatpush3.bf16.msra.mxu0 %v2498_v37 }
 0x9ac   :  { %1859 = vmatprep.subr.bf16.mxu0 %v2142_v0 }
 0xa61   :  { %v1050_v28 = vpop.f32.mrb[32].mxu0 }
 0xa62   :  { %v1057_v29 = vadd.f32 %v1050_v28, %v811_v27  ;;  %v1797_v38 = vpop.f32.mrb[33].mxu0 }
 0xa63   :  { %v1053_v39 = vpop.f32.mrb[34].mxu0 }
 0xa64   :  { %1956 = vtanh.f32 %v1057_v29  ;;  %v1798_v40 = vpop.f32.mrb[35].mxu0 }
 0xa6e   :  { %v1957_v41 = vpop.eup %1956 }
 0xa6f   :  { %v1059_v42 = vpack.c.bf16 %v1957_v41, %v1957_v41 }
 0xa71   :  { %1816 = vmatmul.mubr.bf16.vlgmr.msra.gmra.mrb[24].mxu1 %v1059_v42 }
 0xa72   :  { %1840 = vmatpush3.bf16.msra.mxu1 %v2470_v30  ;;  %1855 = vmatprep.mubr.msk.bf16.mxu1 %vm2143_vm0, %v2142_v0  ;;  %v814_v30 = vadd.f32 %v2517_v45, %v2577_v11 }
 0xa73   :  { %1841 = vmatprep.subr.bf16.mxu1 %v2142_v0 }
 0xa76   :  { %1842 = vmatpush3.bf16.msra.mxu1 %v2474_v31 }
 0xa77   :  { %1843 = vmatprep.subr.bf16.mxu1 %v2142_v0 }
 0xa7a   :  { %1844 = vmatpush3.bf16.msra.mxu1 %v2478_v32 }
 0xa7b   :  { %1845 = vmatprep.subr.bf16.mxu1 %v2142_v0 }
 0xa7e   :  { %1846 = vmatpush3.bf16.msra.mxu1 %v2482_v33 }
 0xa7f   :  { %1847 = vmatprep.subr.bf16.mxu1 %v2142_v0 }
 0xa82   :  { %1848 = vmatpush3.bf16.msra.mxu1 %v2486_v34 }
 0xa83   :  { %1849 = vmatprep.subr.bf16.mxu1 %v2142_v0 }
 0xa86   :  { %1850 = vmatpush3.bf16.msra.mxu1 %v2490_v35  ;;  %v1924_v35 = vld [vmem:[#allocation12] sm:$0xff]  }
 0xa87   :  { %1851 = vmatprep.subr.bf16.mxu1 %v2142_v0 }
 0xa8a   :  { %1852 = vmatpush3.bf16.msra.mxu1 %v2494_v36  ;;  %v1925_v36 = vld [vmem:[#allocation12 + $0x8] sm:$0xff]  }
 0xa8b   :  { %1853 = vmatprep.subr.bf16.mxu1 %v2142_v0 }
 0xa8e   :  { %1854 = vmatpush3.bf16.msra.mxu1 %v2498_v37  ;;  %v1926_v37 = vld [vmem:[#allocation12 + $0x10] sm:$0xff]  }
 0xb44   :  { %v1094_v31 = vpop.f32.mrb[24].mxu1 }
 0xb45   :  { %v1101_v32 = vadd.f32 %v1094_v31, %v814_v30  ;;  %v1817_v33 = vpop.f32.mrb[25].mxu1 }
 0xb46   :  { %v1097_v43 = vpop.f32.mrb[26].mxu1 }
 0xb47   :  { %1958 = vtanh.f32 %v1101_v32  ;;  %v1818_v34 = vpop.f32.mrb[27].mxu1 }
 0xb51   :  { %v1959_v44 = vpop.eup %1958 }
 0xb52   :  { %v1103_v46 = vpack.c.bf16 %v1959_v44, %v1959_v44 }
 0xb54   :  { %1836 = vmatmul.mubr.bf16.vlgmr.msra.gmra.mrb[36].mxu0 %v1103_v46 }
 0xb55   :  { %1875 = vmatprep.mubr.msk.bf16.mxu0 %vm2143_vm0, %v2142_v0  ;;  %1860 = vmatpush3.bf16.msra.mxu0 %v1924_v35 }
 0xb56   :  { %1861 = vmatprep.subr.bf16.mxu0 %v2142_v0 }
 0xb59   :  { %1862 = vmatpush3.bf16.msra.mxu0 %v1925_v36 }
 0xb5a   :  { %1863 = vmatprep.subr.bf16.mxu0 %v2142_v0 }
 0xb5d   :  { %1864 = vmatpush3.bf16.msra.mxu0 %v1926_v37 }
 0xb5e   :  { %1865 = vmatprep.subr.bf16.mxu0 %v2142_v0 }
 0xb61   :  { %1866 = vmatpush3.bf16.msra.mxu0 %v1927_v48 }
 0xb62   :  { %1867 = vmatprep.subr.bf16.mxu0 %v2142_v0 }
 0xb65   :  { %1868 = vmatpush3.bf16.msra.mxu0 %v1928_v57 }
 0xb66   :  { %1869 = vmatprep.subr.bf16.mxu0 %v2142_v0 }
 0xb69   :  { %1870 = vmatpush3.bf16.msra.mxu0 %v1929_v58 }
 0xb6a   :  { %1871 = vmatprep.subr.bf16.mxu0 %v2142_v0 }
 0xb6d   :  { %1872 = vmatpush3.bf16.msra.mxu0 %v1930_v59 }
 0xb6e   :  { %1873 = vmatprep.subr.bf16.mxu0 %v2142_v0 }
 0xb71   :  { %1874 = vmatpush3.bf16.msra.mxu0 %v1931_v60 }
 0xc27   :  { %v1138_v50 = vpop.f32.mrb[36].mxu0 }
 0xc28   :  { %v1145_v51 = vadd.f32 %v1138_v50, %v819_v49  ;;  %v1837_v52 = vpop.f32.mrb[37].mxu0 }
 0xc29   :  { %v1141_v53 = vpop.f32.mrb[38].mxu0 }
 0xc2a   :  { %1960 = vtanh.f32 %v1145_v51  ;;  %v1838_v54 = vpop.f32.mrb[39].mxu0 }
 0xc34   :  { %v1961_v55 = vpop.eup %1960 }
 0xc35   :  { %v1147_v56 = vpack.c.bf16 %v1961_v55, %v1961_v55 }
 0xc37   :  { %1856 = vmatmul.mubr.bf16.vlgmr.msra.gmra.mrb[28].mxu1 %v1147_v56 }
 0xd0a   :  { %v1182_v62 = vpop.f32.mrb[28].mxu1 }
 0xd0b   :  { %v1189_v63 = vadd.f32 %v1182_v62, %v822_v61  ;;  %v1857_v1 = vpop.f32.mrb[29].mxu1 }
 0xd0c   :  { %v1185_v2 = vpop.f32.mrb[30].mxu1 }
 0xd0d   :  { %1962 = vtanh.f32 %v1189_v63  ;;  %v1858_v3 = vpop.f32.mrb[31].mxu1 }
 0xd17   :  { %v1963_v4 = vpop.eup %1962 }
 0xd18   :  { %v1191_v23 = vpack.c.bf16 %v1963_v4, %v1963_v4 }
 0xd1a   :  { %1876 = vmatmul.mubr.bf16.vlgmr.msra.gmra.mrb[40].mxu0 %v1191_v23 }
 0xded   :  { %v1297_v5 = vpop.f32.mrb[40].mxu0 }
 0xdee   :  { %v1298_v0 = vadd.f32 %v1362_v47, %v1297_v5  ;;  %v1877_v6 = vpop.f32.mrb[41].mxu0 }
 0xdef   :  { %v1300_v7 = vpop.f32.mrb[42].mxu0 }
 0xdf0   :  { %v1371_v11 = vmul.f32 -1.442695, %v1298_v0  ;;  %v1878_v8 = vpop.f32.mrb[43].mxu0 }
 0xdf2   :  { %1964 = vpow2.f32 %v1371_v11 }
 0xdfc   :  { %v1965_v45 = vpop.eup %1964 }
 0xdfd   :  { %v1306_v9 = vadd.f32 1.0, %v1965_v45 }
 0xdff   :  { %1966 = vrcp.f32 %v1306_v9 }
 0xe09   :  { %v1967_v10 = vpop.eup %1966 }
 0xe0a   :  { %1309 = vst [vmem:[#allocation14] sm:$0xff] %v1967_v10 }
 0xe0b   :  { %2111 = shalt.err (!%p2108_p10)
}
 0xe0c   :  { %s2112_s25 = scalar_lea.hbm %s2676_s9, 128 }
 0xe0d   :  { %p2113_p11 = scmp.ne.s32.totalorder %s2676_s9, %s2112_s25  ;;  %p2116_p12 = scmp.lt.u32.totalorder %s2112_s25, %s2676_s9 }
 0xe0f   :  { %p2118_p13 = pnand %p2116_p12, %p2113_p11 }
 0xe11   :  { %2121 = shalt.err (!%p2118_p13)
}
 0xe12   :  { %1319 = dma.vmem_to_hbm [thread:$0]  %s1317_s21, 128, %s2676_s9, [#allocation5]  }
 0xe13   :  { %2130 = dma.done.wait [#allocation5], 128  }
 0xe14   :  { %2131 = vsyncadd [#allocation5], 4294967168 }
 0xe15   :  { %1323 = vsyncpa [#allocation4], 1 }
 0xe16   :  { %1324 = vsyncpa [#allocation7], 1 }
 0xe17   :  { %1325 = vsyncpa [#allocation10], 1 }
 0xe18   :  { %1326 = vsyncpa [#allocation13], 1 }
 0xe19   :  { %1327 = vsyncpa [#allocation5], 1 }

</bundles_post_ra>
